<compile_context>
chip_gen: v7x
topology: tpu7x:2x2x1
jax: 0.10.0
libtpu: 0.0.40
codegen_flags: <defaults>
</compile_context>

<pallas_src>
import functools

import jax
import jax.numpy as jnp
from jax.experimental import pallas as pl
from jax.experimental.pallas import tpu as pltpu


# --------------------------------------------------------------------------- #
# Pass 1: per-tile, per-metapath partial score sums
# --------------------------------------------------------------------------- #
def _pass1_kernel(zf_ref, w1_ref, b1_ref, w2r_ref, part_ref, *,
                  m_paths, rows_per_tile, valid_rows_last, mask_pad):
    # Linear(D->H) + bias on the MXU, tanh on the EUP.
    h = jnp.dot(zf_ref[...], w1_ref[...], preferred_element_type=jnp.float32)
    h = jnp.tanh(h + b1_ref[...])                                  # (rows, H) f32
    # Linear(H->1, no bias) as VPU multiply + lane reduction (keeps MXU free).
    s = jnp.sum(h * w2r_ref[...], axis=-1, keepdims=True)          # (rows, 1)

    if mask_pad:
        # Only the last tile contains padded (zero) nodes; zero their scores.
        nvalid = jnp.where(pl.program_id(0) == pl.num_programs(0) - 1,
                           valid_rows_last, rows_per_tile)
        ridx = jax.lax.broadcasted_iota(jnp.int32, (rows_per_tile, 1), 0)
        s = jnp.where(ridx < nvalid, s, 0.0)

    # Per-metapath partial sums: flat row r belongs to metapath r % M.
    row = jax.lax.broadcasted_iota(jnp.int32, (rows_per_tile, m_paths), 0)
    col = jax.lax.broadcasted_iota(jnp.int32, (rows_per_tile, m_paths), 1)
    partial = jnp.sum(jnp.where(row % m_paths == col, s, 0.0),
                      axis=0, keepdims=True)                       # (1, M)
    # (1, 8, M) output block: sublane dim kept at 8 for layout friendliness.
    part_ref[...] = jnp.broadcast_to(partial[None], (1, 8, m_paths))


# --------------------------------------------------------------------------- #
# Pass 2: out[n, :] = sum_m beta[m] * z[n, m, :]
# --------------------------------------------------------------------------- #
def _pass2_kernel(beta_ref, z_ref, o_ref, *, m_paths, d):
    # beta_ref lives in SMEM: scalar reads with static indices.
    acc = beta_ref[0, 0] * z_ref[:, 0:d]
    for m in range(1, m_paths):
        acc = acc + beta_ref[0, m] * z_ref[:, m * d:(m + 1) * d]
    o_ref[...] = acc.astype(o_ref.dtype)


# --------------------------------------------------------------------------- #
# Wrapper
# --------------------------------------------------------------------------- #
def semantic_attention(z, w1, b1, w2, *, tile_n=2048):
    """z: (N, M, D); w1: (D, H); b1: (1, H); w2: (H, 1).  Returns (N, D)."""
    N, M, D = z.shape
    Din, H = w1.shape
    assert Din == D and b1.shape == (1, H) and w2.shape == (H, 1)

    w1 = w1.astype(jnp.float32)
    b1 = b1.astype(jnp.float32)
    w2r = w2.astype(jnp.float32).reshape(1, H)       # row vector for VPU projection

    # N-tile size: multiple of 8 (sublane) unless one tile covers all of N.
    if N <= tile_n:
        tn = N
    else:
        tn = max(8, (min(tile_n, N) // 8) * 8)
    n_pad = (-N) % tn
    np_ = N + n_pad
    nt = np_ // tn
    rows = tn * M                                     # flattened rows per tile

    z_p = jnp.pad(z, ((0, n_pad), (0, 0), (0, 0))) if n_pad else z

    # Free row-major views: (N*M, D) for pass 1; lane-dense (N, M*D) for pass 2.
    zf = z_p.reshape(np_ * M, D)
    z2 = z_p.reshape(np_, M * D)

    itemsize = jnp.dtype(z.dtype).itemsize

    def vmem_limit(*buf_bytes):
        # Double-buffered streamed blocks + headroom; 48 MiB cap stays safe on
        # v7x's 64 MiB physical VMEM while allowing big tiles on v5e/v6e.
        need = sum(2 * b for b in buf_bytes) + (4 << 20)
        return int(min(max(need, 32 << 20), 48 << 20))

    # ---- pass 1: per-tile per-metapath score sums --------------------------- #
    partials = pl.pallas_call(
        functools.partial(
            _pass1_kernel, m_paths=M, rows_per_tile=rows,
            valid_rows_last=(tn - n_pad) * M, mask_pad=n_pad > 0),
        out_shape=jax.ShapeDtypeStruct((nt, 8, M), jnp.float32),
        grid=(nt,),
        in_specs=[
            pl.BlockSpec((rows, D), lambda i: (i, 0)),   # streamed z tiles
            pl.BlockSpec((D, H), lambda i: (0, 0)),      # w1 (resident)
            pl.BlockSpec((1, H), lambda i: (0, 0)),      # b1 (resident)
            pl.BlockSpec((1, H), lambda i: (0, 0)),      # w2 row (resident)
        ],
        out_specs=pl.BlockSpec((1, 8, M), lambda i: (i, 0, 0)),
        compiler_params=pltpu.CompilerParams(
            dimension_semantics=("parallel",),           # independent N-tiles
            vmem_limit_bytes=vmem_limit(rows * D * itemsize, rows * H * 4),
        ),
    )(zf, w1, b1, w2r)                                   # (nt, 8, M)

    # Tiny plain-JAX epilogue: mean over nodes, softmax over metapaths.
    w_mean = jnp.sum(partials[:, 0, :], axis=0) / N      # (M,)
    beta = jax.nn.softmax(w_mean).reshape(1, M).astype(jnp.float32)

    # ---- pass 2: beta-weighted sum over metapaths ---------------------------- #
    out = pl.pallas_call(
        functools.partial(_pass2_kernel, m_paths=M, d=D),
        out_shape=jax.ShapeDtypeStruct((np_, D), z.dtype),
        grid=(nt,),
        in_specs=[
            pl.BlockSpec(memory_space=pltpu.MemorySpace.SMEM),   # beta (M scalars)
            pl.BlockSpec((tn, M * D), lambda i: (i, 0)),         # lane-dense z tiles
        ],
        out_specs=pl.BlockSpec((tn, D), lambda i: (i, 0)),
        compiler_params=pltpu.CompilerParams(
            dimension_semantics=("parallel",),
            vmem_limit_bytes=vmem_limit(tn * M * D * itemsize, tn * D * itemsize),
        ),
    )(beta, z2)

    return out[:N]


# --------------------------------------------------------------------------- #
# Plain-JAX reference matching the PyTorch forward
# --------------------------------------------------------------------------- #
def semantic_attention_ref(z, w1, b1, w2):
    hi = jax.lax.Precision.HIGHEST
    h = jnp.tanh(jnp.einsum('nmd,dh->nmh', z, w1, precision=hi) + b1[0])
    s = jnp.einsum('nmh,hk->nmk', h, w2, precision=hi)   # (N, M, 1)
    w = s.mean(0)                                        # (M, 1)
    beta = jax.nn.softmax(w, axis=0)                     # (M, 1)
    return (beta[None] * z).sum(1)                       # (N, D)


def init_params(key, in_size, hidden_dim):
    # torch.nn.Linear-style init (uniform +/- 1/sqrt(fan_in)).
    k1, k2, k3 = jax.random.split(key, 3)
    bound1 = 1.0 / jnp.sqrt(in_size)
    w1 = jax.random.uniform(k1, (in_size, hidden_dim), jnp.float32, -bound1, bound1)
    b1 = jax.random.uniform(k2, (1, hidden_dim), jnp.float32, -bound1, bound1)
    bound2 = 1.0 / jnp.sqrt(hidden_dim)
    w2 = jax.random.uniform(k3, (hidden_dim, 1), jnp.float32, -bound2, bound2)
    return w1, b1, w2


if __name__ == "__main__":
    key = jax.random.PRNGKey(0)
    kz, kp = jax.random.split(key)

    # Small demo shapes: nodes, metapaths, in_size, hidden_dim (module default 128).
    # N deliberately NOT a multiple of the tile so the padding/mask path is hit;
    # tile_n is small only to exercise the multi-tile grid at demo scale
    # (production default tile_n=2048 gives multi-MiB streamed blocks).
    N, M, D, H = 500, 4, 128, 128
    z = jax.random.normal(kz, (N, M, D), dtype=jnp.float32)
    w1, b1, w2 = init_params(kp, D, H)

    out = jax.block_until_ready(semantic_attention(z, w1, b1, w2, tile_n=192))

    ref = semantic_attention_ref(z, w1, b1, w2)
    assert out.shape == (N, D)
    max_err = float(jnp.max(jnp.abs(out - ref)))
    assert jnp.allclose(out, ref, atol=2e-4, rtol=2e-4), f"max abs err {max_err}"
    print("KERNEL_OK")
</pallas_src>

<mosaic_0001>
module attributes {stable_mosaic.version = 11 : i64} {
  func.func @_pass1_kernel(%arg0: i32, %arg1: memref<768x128xf32, #tpu.memory_space<vmem>>, %arg2: memref<128x128xf32, #tpu.memory_space<vmem>>, %arg3: memref<1x128xf32, #tpu.memory_space<vmem>>, %arg4: memref<1x128xf32, #tpu.memory_space<vmem>>, %arg5: memref<1x8x4xf32, #tpu.memory_space<vmem>>) attributes {dimension_semantics = [#tpu.dimension_semantics<parallel>], iteration_bounds = array<i64: 3>, scalar_prefetch = 0 : i64, scratch_operands = 0 : i64, tpu.core_type = #tpu.core_type<tc>, window_params = [{transform_indices = @transform_0, window_bounds = array<i64: 768, 128>}, {pipeline_mode = #tpu.pipeline_mode<synchronous>, transform_indices = @transform_1, window_bounds = array<i64: 128, 128>}, {pipeline_mode = #tpu.pipeline_mode<synchronous>, transform_indices = @transform_2, window_bounds = array<i64: 1, 128>}, {pipeline_mode = #tpu.pipeline_mode<synchronous>, transform_indices = @transform_3, window_bounds = array<i64: 1, 128>}, {transform_indices = @transform_4, window_bounds = array<i64: 1, 8, 4>}]} {
    %c0 = arith.constant 0 : index
    %c0_0 = arith.constant 0 : index
    %0 = vector.load %arg1[%c0, %c0_0] : memref<768x128xf32, #tpu.memory_space<vmem>>, vector<768x128xf32>
    %c0_1 = arith.constant 0 : index
    %c0_2 = arith.constant 0 : index
    %1 = vector.load %arg2[%c0_1, %c0_2] : memref<128x128xf32, #tpu.memory_space<vmem>>, vector<128x128xf32>
    %cst = arith.constant dense<0.000000e+00> : vector<768x128xf32>
    %2 = tpu.matmul %0, %1, %cst {dimension_numbers = #tpu.dot_dimension_numbers<[1], [0], [0], [1], [0, 0, 1, 1], [], []>} : vector<768x128xf32>, vector<128x128xf32>, vector<768x128xf32> -> vector<768x128xf32>
    %c0_3 = arith.constant 0 : index
    %c0_4 = arith.constant 0 : index
    %3 = vector.load %arg3[%c0_3, %c0_4] : memref<1x128xf32, #tpu.memory_space<vmem>>, vector<1x128xf32>
    %4 = vector.broadcast %3 : vector<1x128xf32> to vector<768x128xf32>
    %5 = arith.addf %2, %4 : vector<768x128xf32>
    %6 = math.tanh %5 : vector<768x128xf32>
    %c0_5 = arith.constant 0 : index
    %c0_6 = arith.constant 0 : index
    %7 = vector.load %arg4[%c0_5, %c0_6] : memref<1x128xf32, #tpu.memory_space<vmem>>, vector<1x128xf32>
    %8 = vector.broadcast %7 : vector<1x128xf32> to vector<768x128xf32>
    %9 = arith.mulf %6, %8 : vector<768x128xf32>
    %cst_7 = arith.constant dense<0.000000e+00> : vector<768xf32>
    %10 = vector.multi_reduction <add>, %9, %cst_7 [1] : vector<768x128xf32> to vector<768xf32>
    %11 = vector.shape_cast %10 : vector<768xf32> to vector<768x1xf32>
    %c2_i32 = arith.constant 2 : i32
    %12 = arith.cmpi eq, %arg0, %c2_i32 : i32
    %c464_i32 = arith.constant 464 : i32
    %c768_i32 = arith.constant 768 : i32
    %13 = arith.select %12, %c464_i32, %c768_i32 : i32
    %14 = tpu.iota {dimensions = array<i32: 0>} : vector<768x1xi32>
    %15 = vector.broadcast %13 : i32 to vector<768x1xi32>
    %16 = arith.cmpi slt, %14, %15 : vector<768x1xi32>
    %cst_8 = arith.constant 0.000000e+00 : f32
    %17 = vector.broadcast %cst_8 : f32 to vector<768x1xf32>
    %18 = arith.select %16, %11, %17 : vector<768x1xi1>, vector<768x1xf32>
    %19 = tpu.iota {dimensions = array<i32: 0>} : vector<768x4xi32>
    %20 = tpu.iota {dimensions = array<i32: 1>} : vector<768x4xi32>
    %c4_i32 = arith.constant 4 : i32
    %c0_i32 = arith.constant 0 : i32
    %21 = arith.cmpi eq, %c4_i32, %c0_i32 : i32
    %c1_i32 = arith.constant 1 : i32
    %22 = arith.select %21, %c1_i32, %c4_i32 : i32
    %23 = vector.broadcast %22 : i32 to vector<768x4xi32>
    %24 = arith.remsi %19, %23 : vector<768x4xi32>
    %c0_i32_9 = arith.constant 0 : i32
    %25 = vector.broadcast %c0_i32_9 : i32 to vector<768x4xi32>
    %26 = arith.cmpi ne, %24, %25 : vector<768x4xi32>
    %c0_i32_10 = arith.constant 0 : i32
    %27 = vector.broadcast %c0_i32_10 : i32 to vector<768x4xi32>
    %28 = arith.cmpi slt, %24, %27 : vector<768x4xi32>
    %c0_i32_11 = arith.constant 0 : i32
    %29 = arith.cmpi slt, %22, %c0_i32_11 : i32
    %30 = vector.broadcast %29 : i1 to vector<768x4xi1>
    %31 = vector.broadcast %30 : vector<768x4xi1> to vector<768x4xi1>
    %32 = arith.xori %28, %31 : vector<768x4xi1>
    %33 = arith.andi %32, %26 : vector<768x4xi1>
    %34 = vector.broadcast %22 : i32 to vector<768x4xi32>
    %35 = arith.addi %24, %34 : vector<768x4xi32>
    %36 = arith.select %33, %35, %24 : vector<768x4xi1>, vector<768x4xi32>
    %37 = arith.cmpi eq, %36, %20 : vector<768x4xi32>
    %cst_12 = arith.constant 0.000000e+00 : f32
    %38 = vector.shape_cast %18 : vector<768x1xf32> to vector<768x1xf32>
    %39 = vector.broadcast %38 : vector<768x1xf32> to vector<768x4xf32>
    %40 = vector.broadcast %cst_12 : f32 to vector<768x4xf32>
    %41 = arith.select %37, %39, %40 : vector<768x4xi1>, vector<768x4xf32>
    %cst_13 = arith.constant dense<0.000000e+00> : vector<4xf32>
    %42 = vector.multi_reduction <add>, %41, %cst_13 [0] : vector<768x4xf32> to vector<4xf32>
    %43 = vector.shape_cast %42 : vector<4xf32> to vector<1x4xf32>
    %44 = vector.shape_cast %43 : vector<1x4xf32> to vector<1x1x4xf32>
    %45 = vector.shape_cast %44 : vector<1x1x4xf32> to vector<1x1x4xf32>
    %46 = vector.broadcast %45 : vector<1x1x4xf32> to vector<1x8x4xf32>
    %c0_14 = arith.constant 0 : index
    %c0_15 = arith.constant 0 : index
    %c0_16 = arith.constant 0 : index
    %47 = vector.load %arg5[%c0_14, %c0_15, %c0_16] : memref<1x8x4xf32, #tpu.memory_space<vmem>>, vector<1x8x4xf32>
    tpu.vector_store %arg5[%c0_14, %c0_15, %c0_16], %46 {strides = array<i32>} : memref<1x8x4xf32, #tpu.memory_space<vmem>>, vector<1x8x4xf32>,
    return
  }
  func.func @transform_0(%arg0: i32) -> (i32, i32) {
    %c0_i32 = arith.constant 0 : i32
    %c0_i32_0 = arith.constant 0 : i32
    return %arg0, %c0_i32 : i32, i32
  }
  func.func @transform_1(%arg0: i32) -> (i32, i32) {
    %c0_i32 = arith.constant 0 : i32
    %c0_i32_0 = arith.constant 0 : i32
    %c0_i32_1 = arith.constant 0 : i32
    return %c0_i32, %c0_i32_0 : i32, i32
  }
  func.func @transform_2(%arg0: i32) -> (i32, i32) {
    %c0_i32 = arith.constant 0 : i32
    %c0_i32_0 = arith.constant 0 : i32
    %c0_i32_1 = arith.constant 0 : i32
    return %c0_i32, %c0_i32_0 : i32, i32
  }
  func.func @transform_3(%arg0: i32) -> (i32, i32) {
    %c0_i32 = arith.constant 0 : i32
    %c0_i32_0 = arith.constant 0 : i32
    %c0_i32_1 = arith.constant 0 : i32
    return %c0_i32, %c0_i32_0 : i32, i32
  }
  func.func @transform_4(%arg0: i32) -> (i32, i32, i32) {
    %c0_i32 = arith.constant 0 : i32
    %c0_i32_0 = arith.constant 0 : i32
    %c0_i32_1 = arith.constant 0 : i32
    return %arg0, %c0_i32, %c0_i32_0 : i32, i32, i32
  }
}

</mosaic_0001>

<bundles_post_ra>
// kernel: tpu_custom_call.1
= control target key start
LH: loop header
LB: loop body
LE: loop exit
PB: predicated region body
PF: predicated region fallthrough
CT: control target
= control target key end

     0   :  { %9 = vsyncpa [#allocation3], 0  ;;  %s5977_s0 = inlined_call_operand.hbm [shape: f32[2304,128], index: 0, kind: input, shape index: {}]   ;;  %s5978_s1 = inlined_call_operand.hbm [shape: f32[128,128], index: 1, kind: input, shape index: {}]   ;;  %s5979_s2 = inlined_call_operand.hbm [shape: f32[1,128], index: 2, kind: input, shape index: {}]   ;;  %s5980_s3 = inlined_call_operand.hbm [shape: f32[1,128], index: 3, kind: input, shape index: {}]   ;;  %s5981_s4 = inlined_call_operand.vmem [shape: f32[3,8,4], index: 4, kind: output, shape index: {}]  }
   0x1   :  { %11 = vsyncpa [#allocation3 + $0x1], 0 }
   0x2   :  { %12 = vsyncpa [#allocation5], 0 }
   0x3   :  { %13 = vsyncpa [#allocation8], 0  ;;  %s4053_s15 = smov 0   ;;  %s4055_s16 = smov 0  }
   0x4   :  { %s4057_s17 = smov 0   ;;  %s4059_s18 = smov 0  }
   0x5 LB: > { %s4072_s19 = sadd.s32 4294967295, %s4020_s18   ;;  %p39_p0 = scmp.ne.s32.totalorder %s4012_s16, %s4008_s15  ;;  %s4020_s18 = sphi %s4059_s18, %s6185_s18   ;;  %s4016_s17 = sphi %s4057_s17, %s6184_s17   ;;  %s4012_s16 = sphi %s4055_s16, %s6183_s16   ;;  %s4008_s15 = sphi %s4053_s15, %s6182_s15  }
   0x6   : > { %p5982_p1 = scmp.eq.s32.totalorder %s4072_s19, 0  ;;  %p3244_p2 = scmp.ge.s32.totalorder %s4020_s18, 1 }
   0x7   : > { %p139_p3 = scmp.lt.s32.totalorder %s4020_s18, 4  ;;  %s4022_s22 = smov [#allocation4]  }
   0x8   : > { %p4080_p4 = por %p5982_p1, %p39_p0  ;;  %s151_s23 = sshll.u32 %s4022_s22, 4  ;;  %s4088_s23 = int_to_ptr.vmem [resolvable:$true] %s151_s23 }
   0x9   : > { %p4084_p5 = pnand %p3244_p2, %p139_p3  ;;  %s4023_s25 = smov [#allocation6]  }
   0xa   : > { %s5985_s20 = scalar_select %p4080_p4, 1, 0 }
   0xb   : > { %s5986_s21 = scalar_select %p4084_p5, 1, 0 }
   0xc   : > { %p3612_p6 = pneg %p4084_p5  ;;  %s165_s26 = sshll.u32 %s4023_s25, 4  ;;  %s4098_s26 = int_to_ptr.vmem [resolvable:$true] %s165_s26 }
   0xd   : > { %s4024_s27 = smov [#allocation7]   ;;  %s3864_s5 = scalar_lea.hbm %s5978_s1, 2048 }
   0xe   : > { %p4094_p7 = pnand %p3612_p6, %p5982_p1  ;;  %s4100_s28 = sshll.u32 %s4024_s27, 4  ;;  %s177_s28 = int_to_ptr.vmem [resolvable:$true] %s4100_s28 }
   0xf   : > { %p3865_p8 = scmp.ne.s32.totalorder %s5978_s1, %s3864_s5  ;;  %p3871_p12 = scmp.lt.u32.totalorder %s3864_s5, %s5978_s1 }
  0x10   : > { %p4110_p9 = pneg %p4094_p7 }
  0x12   : > { %p3867_p10 = pnand %p4110_p9, %p3865_p8 }
  0x14   : > { %p3868_p11 = pneg %p3867_p10 }
  0x16   : > { %p3873_p13 = pnand %p3871_p12, %p3868_p11 }
  0x18   : > { %3876 = shalt.err (!%p3873_p13)
}
  0x19   : > { %s3877_s11 = scalar_lea.vmem %s4088_s23, 2048  ;;  %p3885_p6 = scmp.lt.s32.totalorder %s4088_s23, %s4088_s23 }
  0x1a   : > { %p3878_p0 = scmp.ne.s32.totalorder %s4088_s23, %s3877_s11  ;;  %p3886_p1 = scmp.lt.s32.totalorder %s3877_s11, %s3877_s11 }
  0x1c   : > { %p3880_p2 = pnand %p3878_p0, %p4110_p9  ;;  %p3887_p8 = por %p3886_p1, %p3885_p6 }
  0x1e   : > { %p3881_p3 = pneg %p3880_p2 }
  0x20   : > { %p3888_p10 = pnand %p3887_p8, %p3881_p3 }
  0x22   : > { %3891 = shalt.err (!%p3888_p10)
}
  0x23   : > { %s4025_s12 = smov 128   ;;  %s4026_s13 = smov 8  }
  0x24   : > { %3615 = dma.hbm_to_vmem [thread:$0]  (!%p4094_p7), %s5978_s1, 2048, %s4088_s23, [#allocation5], %s4025_s12, %s4025_s12, %s4026_s13  }
  0x25   : > { %s3892_s27 = scalar_lea.hbm %s5979_s2, 16 }
  0x26   : > { %p3893_p1 = scmp.ne.s32.totalorder %s5979_s2, %s3892_s27  ;;  %p3899_p13 = scmp.lt.u32.totalorder %s3892_s27, %s5979_s2 }
  0x28   : > { %p3895_p11 = pnand %p3893_p1, %p4110_p9 }
  0x2a   : > { %p3896_p12 = pneg %p3895_p11 }
  0x2c   : > { %p3901_p0 = pnand %p3899_p13, %p3896_p12 }
  0x2e   : > { %3904 = shalt.err (!%p3901_p0)
}
  0x2f   : > { %s3905_s23 = scalar_lea.vmem %s4098_s26, 16  ;;  %s3912_s7 = scalar_lea.vmem %s4098_s26, 32 }
  0x30   : > { %p3906_p2 = scmp.ne.s32.totalorder %s4098_s26, %s3905_s23  ;;  %p3913_p8 = scmp.lt.s32.totalorder %s4098_s26, %s4098_s26 }
  0x31   : > { %p3914_p10 = scmp.lt.s32.totalorder %s3912_s7, %s3905_s23 }
  0x32   : > { %p3908_p3 = pnand %p3906_p2, %p4110_p9 }
  0x33   : > { %p3915_p1 = por %p3914_p10, %p3913_p8 }
  0x34   : > { %p3909_p6 = pneg %p3908_p3 }
  0x36   : > { %p3916_p11 = pnand %p3915_p1, %p3909_p6 }
  0x38   : > { %3919 = shalt.err (!%p3916_p11)
}
  0x39   : > { %3618 = dma.hbm_to_vmem [thread:$0]  (!%p4094_p7), %s5979_s2, 16, %s4098_s26, [#allocation5]  }
  0x3a   : > { %s3920_s15 = scalar_lea.hbm %s5980_s3, 16 }
  0x3b   : > { %p3921_p12 = scmp.ne.s32.totalorder %s5980_s3, %s3920_s15  ;;  %p3927_p2 = scmp.lt.u32.totalorder %s3920_s15, %s5980_s3 }
  0x3d   : > { %p3923_p13 = pnand %p3921_p12, %p4110_p9 }
  0x3f   : > { %p3924_p0 = pneg %p3923_p13 }
  0x41   : > { %p3929_p3 = pnand %p3927_p2, %p3924_p0 }
  0x43   : > { %3932 = shalt.err (!%p3929_p3)
}
  0x44   : > { %s3933_s30 = scalar_lea.vmem %s177_s28, 16  ;;  %s3940_s26 = scalar_lea.vmem %s177_s28, 32 }
  0x45   : > { %p3934_p6 = scmp.ne.s32.totalorder %s177_s28, %s3933_s30  ;;  %p3941_p1 = scmp.lt.s32.totalorder %s177_s28, %s177_s28 }
  0x46   : > { %p3942_p11 = scmp.lt.s32.totalorder %s3940_s26, %s3933_s30 }
  0x47   : > { %p3936_p8 = pnand %p3934_p6, %p4110_p9 }
  0x48   : > { %p3943_p4 = por %p3942_p11, %p3941_p1 }
  0x49   : > { %p3937_p10 = pneg %p3936_p8 }
  0x4b   : > { %p3944_p5 = pnand %p3943_p4, %p3937_p10 }
  0x4d   : > { %3947 = shalt.err (!%p3944_p5)
}
  0x4e   : > { %3621 = dma.hbm_to_vmem [thread:$0]  (!%p4094_p7), %s5980_s3, 16, %s177_s28, [#allocation8]  }
  0x4f   : > { %s4178_s8 = sadd.s32 1, %s4020_s18   ;;  %s26_s7 = sadd.s32 1, %s4016_s17 }
  0x50   : > { %s23_s23 = ssub.s32 %s4020_s18, %s4178_s8  ;;  %p33_p5 = scmp.ne.s32.totalorder %s4016_s17, %s4012_s16 }
  0x51   : > { %p24_p4 = scmp.eq.s32.totalorder %s23_s23, 0  ;;  %p34_p9 = scmp.eq.s32.totalorder %s4020_s18, 0 }
  0x52   : > { %p3629_p12 = scmp.lt.s32.totalorder %s4020_s18, 3  ;;  %s187_s9 = sand.u32 1, %s4016_s17  }
  0x53   : > { %s4188_s24 = scalar_select %p24_p4, %s4016_s17, %s26_s7  }
  0x54   : > { %p35_p13 = por %p34_p9, %p33_p5  ;;  %s3596_s10 = smul.u32 768, %s187_s9 }
  0x55   : > { %s3259_s11 = smul.u32 12288, %s4020_s18  ;;  %s4203_s18 = scalar_lea.sflag [#allocation3], %s187_s9 }
  0x56   : > { %p4192_p0 = pnand %p3629_p12, %p35_p13  ;;  %s191_s25 = scalar_lea.vmem [#allocation2], %s3596_s10 }
  0x57   : > { %s4199_s22 = scalar_lea.hbm %s5977_s0, %s3259_s11  ;;  %s198_s27 = sshll.u32 %s191_s25, 4  ;;  %s4201_s27 = int_to_ptr.vmem [resolvable:$true] %s198_s27 }
  0x58   : > { %s3948_s29 = scalar_lea.hbm %s4199_s22, 12288  ;;  %p3950_p2 = pneg %p4192_p0 }
  0x59   : > { %p3949_p7 = scmp.ne.s32.totalorder %s4199_s22, %s3948_s29  ;;  %s3953_s5 = scalar_lea.hbm %s5977_s0, 36864 }
  0x5a   : > { %p3954_p8 = scmp.lt.u32.totalorder %s4199_s22, %s5977_s0  ;;  %p3955_p10 = scmp.lt.u32.totalorder %s3953_s5, %s3948_s29 }
  0x5b   : > { %p3951_p3 = pnand %p3950_p2, %p3949_p7  ;;  %p3957_p11 = scmp.lt.u32.totalorder %s3948_s29, %s4199_s22 }
  0x5c   : > { %p3956_p1 = por %p3955_p10, %p3954_p8 }
  0x5d   : > { %p3952_p6 = pneg %p3951_p3 }
  0x5e   : > { %p3958_p4 = por %p3957_p11, %p3956_p1 }
  0x60   : > { %p3959_p5 = pnand %p3958_p4, %p3952_p6 }
  0x62   : > { %3962 = shalt.err (!%p3959_p5)
}
  0x63   : > { %s3963_s7 = scalar_lea.vmem %s4201_s27, 12288  ;;  %s4027_s9 = smov [#allocation2]  }
  0x64   : > { %p3964_p9 = scmp.ne.s32.totalorder %s4201_s27, %s3963_s7  ;;  %s3968_s10 = sshll.u32 %s4027_s9, 4  ;;  %s3969_s10 = int_to_ptr.vmem [resolvable:$false] %s3968_s10 }
  0x65   : > { %s3970_s11 = scalar_lea.vmem %s3969_s10, 24576  ;;  %p3971_p7 = scmp.lt.s32.totalorder %s4201_s27, %s3969_s10 }
  0x66   : > { %p3966_p12 = pnand %p3964_p9, %p3950_p2  ;;  %p3972_p3 = scmp.lt.s32.totalorder %s3970_s11, %s3963_s7 }
  0x68   : > { %p3967_p13 = pneg %p3966_p12  ;;  %p3973_p8 = por %p3972_p3, %p3971_p7 }
  0x6a   : > { %p3974_p10 = pnand %p3973_p8, %p3967_p13 }
  0x6c   : > { %3977 = shalt.err (!%p3974_p10)
}
  0x6d   : > { %3625 = dma.hbm_to_vmem [thread:$0]  (!%p4192_p0), %s4199_s22, 12288, %s4201_s27, %s4203_s18, %s4025_s12, %s4025_s12, %s4026_s13  }
  0x6e   : > { %p5990_p2 = scmp.ne.s32.totalorder %s5986_s21, 0 }
  0x6f   : > { %s212_s28 = sand.u32 (!%p5990_p2), 1, %s4012_s16   ;;  %p5991_p6 = scmp.ne.s32.totalorder (!%p5990_p2), %s5985_s20, 0 }
  0x70   : > { %210 = sbr.rel (%p5990_p2) target bundleno = 742 (0x2e6), region = 36  ;;  %s213_s25 = scalar_lea.sflag (!%p5990_p2), [#allocation3], %s212_s28 }
  0x71   : > { %s3597_s15 = smul.u32 (!%p5990_p2), 768, %s212_s28 }
  0x73   : > { %s4237_s29 = scalar_lea.vmem (!%p5990_p2), [#allocation2], %s3597_s15 }
  0x77   : > { %3995 = dma.done.wait (%p5991_p6), %s213_s25, 12288  }
  0x78   : > { %3997 = vsyncadd (%p5991_p6), %s213_s25, 4294955008  ;;  %p5992_p1 = scmp.eq.s32.totalorder %s4072_s19, 0 }
  0x7a   : > { %3999 = dma.done.wait (%p5992_p1), [#allocation5], 2064   ;;  %p5993_p0 = pmov %p5992_p1 }
  0x7c   : > { %4001 = vsyncadd (%p5993_p0), [#allocation5], 4294965232  ;;  %p5994_p11 = pmov %p5993_p0 }
  0x7d   : > { %p5995_p4 = pmov %p5993_p0 }
  0x7e   : > { %4003 = dma.done.wait (%p5994_p11), [#allocation8], 16  }
  0x7f   : > { %4005 = vsyncadd (%p5995_p4), [#allocation8], 4294967280  ;;  %v353_v0 = vld [vmem:[#allocation4] sm:$0xff]  ;;  %v354_v1 = vld [vmem:[#allocation4 + $0x8] sm:$0xff]  ;;  %p1312_p5 = scmp.eq.s32.totalorder %s4072_s19, 2  ;;  %vm2950_vm2 = vcmask 31744  }
  0x80   : > { %v355_v2 = vld [vmem:[#allocation4 + $0x10] sm:$0xff]  ;;  %v3548_v3 = vpack.c.bf16 %v354_v1, %v353_v0  ;;  %v356_v4 = vld [vmem:[#allocation4 + $0x18] sm:$0xff]  ;;  %v357_v6 = vld [vmem:[#allocation4 + $0x20] sm:$0xff]  ;;  %p253_p9 = scmp.lt.s32.totalorder %s4072_s19, 2 }
  0x81   : > { %v3552_v5 = vpack.c.bf16 %v356_v4, %v355_v2  ;;  %v358_v7 = vld [vmem:[#allocation4 + $0x28] sm:$0xff]  ;;  %v257_v9 = vld [vmem:[%s4237_s29] sm:$0xff]  ;;  %v359_v10 = vld [vmem:[#allocation4 + $0x30] sm:$0xff]  ;;  %s1313_s20 = scalar_select %p1312_p5, 464, 768 }
  0x82   : > { %3549 = vmatprep.subr.bf16.mxu0 %v3548_v3  ;;  %3580 = vmatprep.subr.bf16.mxu1 %v3548_v3  ;;  %v3556_v8 = vpack.c.bf16 %v358_v7, %v357_v6  ;;  %v360_v11 = vld [vmem:[#allocation4 + $0x38] sm:$0xff]  ;;  %v361_v13 = vld [vmem:[#allocation4 + $0x40] sm:$0xff]  ;;  %v362_v14 = vld [vmem:[#allocation4 + $0x48] sm:$0xff]  ;;  %s6187_s19 = smov (!%p253_p9, %s4072_s19), 2 }
  0x83   : > { %3551 = vmatpush3.bf16.msra.mxu0 %v3548_v3  ;;  %3588 = vmatpush3.bf16.msra.mxu1 %v3548_v3  ;;  %v3560_v12 = vpack.c.bf16 %v360_v11, %v359_v10  ;;  %v3564_v15 = vpack.c.bf16 %v362_v14, %v361_v13  ;;  %v363_v16 = vld [vmem:[#allocation4 + $0x50] sm:$0xff]  ;;  %v364_v17 = vld [vmem:[#allocation4 + $0x58] sm:$0xff]  ;;  %v365_v19 = vld [vmem:[#allocation4 + $0x60] sm:$0xff]  ;;  %s3254_s21 = sshll.u32 %s6187_s19, 3 }
  0x84   : > { %3553 = vmatprep.subr.bf16.mxu0 %v3552_v5  ;;  %3581 = vmatprep.subr.bf16.mxu1 %v3552_v5  ;;  %v3568_v18 = vpack.c.bf16 %v364_v17, %v363_v16  ;;  %v366_v20 = vld [vmem:[#allocation4 + $0x68] sm:$0xff]  ;;  %v305_v22 = vld [vmem:[%s4237_s29 + $0x180] sm:$0xff]  ;;  %v367_v23 = vld [vmem:[#allocation4 + $0x70] sm:$0xff]  ;;  %s256_s14 = scalar_lea.vmem %s5981_s4, %s3254_s21 }
  0x85   : > { %3404 = vmatprep.mubr.f32.mxu0 %v257_v9  ;;  %v3572_v21 = vpack.c.bf16 %v366_v20, %v365_v19  ;;  %v368_v24 = vld [vmem:[#allocation4 + $0x78] sm:$0xff]  ;;  %3476 = vmatprep.mubr.f32.mxu1 %v305_v22  ;;  %v258_v26 = vld [vmem:[%s4237_s29 + $0x8] sm:$0xff]  ;;  %v259_v28 = vld [vmem:[%s4237_s29 + $0x10] sm:$0xff] }
  0x86   : > { %v3576_v25 = vpack.c.bf16 %v368_v24, %v367_v23  ;;  %v306_v27 = vld [vmem:[%s4237_s29 + $0x188] sm:$0xff]  ;;  %v307_v29 = vld [vmem:[%s4237_s29 + $0x190] sm:$0xff]  ;;  %v260_v30 = vld [vmem:[%s4237_s29 + $0x18] sm:$0xff] }
  0x87   : > { %3555 = vmatpush3.bf16.msra.mxu0 %v3552_v5  ;;  %3589 = vmatpush3.bf16.msra.mxu1 %v3552_v5  ;;  %v308_v31 = vld [vmem:[%s4237_s29 + $0x198] sm:$0xff]  ;;  %v261_v32 = vld [vmem:[%s4237_s29 + $0x20] sm:$0xff]  ;;  %v262_v34 = vld [vmem:[%s4237_s29 + $0x28] sm:$0xff] }
  0x88   : > { %3557 = vmatprep.subr.bf16.mxu0 %v3556_v8  ;;  %3582 = vmatprep.subr.bf16.mxu1 %v3556_v8  ;;  %v309_v33 = vld [vmem:[%s4237_s29 + $0x1a0] sm:$0xff]  ;;  %v310_v35 = vld [vmem:[%s4237_s29 + $0x1a8] sm:$0xff]  ;;  %v263_v36 = vld [vmem:[%s4237_s29 + $0x30] sm:$0xff] }
  0x89   : > { %v311_v37 = vld [vmem:[%s4237_s29 + $0x1b0] sm:$0xff]  ;;  %v264_v38 = vld [vmem:[%s4237_s29 + $0x38] sm:$0xff]  ;;  %v265_v40 = vld [vmem:[%s4237_s29 + $0x40] sm:$0xff] }
  0x8a   : > { %v312_v39 = vld [vmem:[%s4237_s29 + $0x1b8] sm:$0xff]  ;;  %v313_v41 = vld [vmem:[%s4237_s29 + $0x1c0] sm:$0xff]  ;;  %v266_v42 = vld [vmem:[%s4237_s29 + $0x48] sm:$0xff] }
  0x8b   : > { %3559 = vmatpush3.bf16.msra.mxu0 %v3556_v8  ;;  %3590 = vmatpush3.bf16.msra.mxu1 %v3556_v8  ;;  %v314_v43 = vld [vmem:[%s4237_s29 + $0x1c8] sm:$0xff]  ;;  %v267_v44 = vld [vmem:[%s4237_s29 + $0x50] sm:$0xff]  ;;  %v268_v46 = vld [vmem:[%s4237_s29 + $0x58] sm:$0xff] }
  0x8c   : > { %3561 = vmatprep.subr.bf16.mxu0 %v3560_v12  ;;  %3583 = vmatprep.subr.bf16.mxu1 %v3560_v12  ;;  %v315_v45 = vld [vmem:[%s4237_s29 + $0x1d0] sm:$0xff]  ;;  %v316_v47 = vld [vmem:[%s4237_s29 + $0x1d8] sm:$0xff]  ;;  %v269_v48 = vld [vmem:[%s4237_s29 + $0x60] sm:$0xff] }
  0x8d   : > { %v317_v49 = vld [vmem:[%s4237_s29 + $0x1e0] sm:$0xff]  ;;  %v270_v50 = vld [vmem:[%s4237_s29 + $0x68] sm:$0xff]  ;;  %v271_v52 = vld [vmem:[%s4237_s29 + $0x70] sm:$0xff] }
  0x8e   : > { %v318_v51 = vld [vmem:[%s4237_s29 + $0x1e8] sm:$0xff]  ;;  %v319_v53 = vld [vmem:[%s4237_s29 + $0x1f0] sm:$0xff]  ;;  %v272_v54 = vld [vmem:[%s4237_s29 + $0x78] sm:$0xff] }
  0x8f   : > { %3563 = vmatpush3.bf16.msra.mxu0 %v3560_v12  ;;  %3591 = vmatpush3.bf16.msra.mxu1 %v3560_v12  ;;  %v320_v55 = vld [vmem:[%s4237_s29 + $0x1f8] sm:$0xff]  ;;  %v273_v56 = vld [vmem:[%s4237_s29 + $0x80] sm:$0xff]  ;;  %v274_v58 = vld [vmem:[%s4237_s29 + $0x88] sm:$0xff] }
  0x90   : > { %3565 = vmatprep.subr.bf16.mxu0 %v3564_v15  ;;  %3584 = vmatprep.subr.bf16.mxu1 %v3564_v15  ;;  %v321_v57 = vld [vmem:[%s4237_s29 + $0x200] sm:$0xff]  ;;  %v322_v59 = vld [vmem:[%s4237_s29 + $0x208] sm:$0xff]  ;;  %v275_v60 = vld [vmem:[%s4237_s29 + $0x90] sm:$0xff] }
  0x91   : > { %v323_v61 = vld [vmem:[%s4237_s29 + $0x210] sm:$0xff]  ;;  %v276_v62 = vld [vmem:[%s4237_s29 + $0x98] sm:$0xff]  ;;  %v277_v0 = vld [vmem:[%s4237_s29 + $0xa0] sm:$0xff] }
  0x92   : > { %v324_v63 = vld [vmem:[%s4237_s29 + $0x218] sm:$0xff]  ;;  %v325_v1 = vld [vmem:[%s4237_s29 + $0x220] sm:$0xff]  ;;  %v278_v2 = vld [vmem:[%s4237_s29 + $0xa8] sm:$0xff] }
  0x93   : > { %3567 = vmatpush3.bf16.msra.mxu0 %v3564_v15  ;;  %3592 = vmatpush3.bf16.msra.mxu1 %v3564_v15  ;;  %v326_v3 = vld [vmem:[%s4237_s29 + $0x228] sm:$0xff]  ;;  %v279_v4 = vld [vmem:[%s4237_s29 + $0xb0] sm:$0xff]  ;;  %v280_v6 = vld [vmem:[%s4237_s29 + $0xb8] sm:$0xff] }
  0x94   : > { %3569 = vmatprep.subr.bf16.mxu0 %v3568_v18  ;;  %3585 = vmatprep.subr.bf16.mxu1 %v3568_v18  ;;  %v327_v5 = vld [vmem:[%s4237_s29 + $0x230] sm:$0xff]  ;;  %v328_v7 = vld [vmem:[%s4237_s29 + $0x238] sm:$0xff]  ;;  %v281_v8 = vld [vmem:[%s4237_s29 + $0xc0] sm:$0xff] }
  0x95   : > { %v329_v9 = vld [vmem:[%s4237_s29 + $0x240] sm:$0xff]  ;;  %v282_v10 = vld [vmem:[%s4237_s29 + $0xc8] sm:$0xff]  ;;  %v283_v12 = vld [vmem:[%s4237_s29 + $0xd0] sm:$0xff] }
  0x96   : > { %v330_v11 = vld [vmem:[%s4237_s29 + $0x248] sm:$0xff]  ;;  %v331_v13 = vld [vmem:[%s4237_s29 + $0x250] sm:$0xff]  ;;  %v284_v14 = vld [vmem:[%s4237_s29 + $0xd8] sm:$0xff] }
  0x97   : > { %3571 = vmatpush3.bf16.msra.mxu0 %v3568_v18  ;;  %3593 = vmatpush3.bf16.msra.mxu1 %v3568_v18  ;;  %v332_v15 = vld [vmem:[%s4237_s29 + $0x258] sm:$0xff]  ;;  %v285_v16 = vld [vmem:[%s4237_s29 + $0xe0] sm:$0xff]  ;;  %v286_v18 = vld [vmem:[%s4237_s29 + $0xe8] sm:$0xff] }
  0x98   : > { %3573 = vmatprep.subr.bf16.mxu0 %v3572_v21  ;;  %3586 = vmatprep.subr.bf16.mxu1 %v3572_v21  ;;  %v333_v17 = vld [vmem:[%s4237_s29 + $0x260] sm:$0xff]  ;;  %v334_v19 = vld [vmem:[%s4237_s29 + $0x268] sm:$0xff]  ;;  %v287_v20 = vld [vmem:[%s4237_s29 + $0xf0] sm:$0xff] }
  0x99   : > { %v288_v22 = vld [vmem:[%s4237_s29 + $0xf8] sm:$0xff]  ;;  %v289_v24 = vld [vmem:[%s4237_s29 + $0x100] sm:$0xff] }
  0x9a   : > { %v336_v23 = vld [vmem:[%s4237_s29 + $0x278] sm:$0xff] }
  0x9b   : > { %3575 = vmatpush3.bf16.msra.mxu0 %v3572_v21  ;;  %3594 = vmatpush3.bf16.msra.mxu1 %v3572_v21  ;;  %v335_v21 = vld [vmem:[%s4237_s29 + $0x270] sm:$0xff] }
  0x9c   : > { %3577 = vmatprep.subr.bf16.mxu0 %v3576_v25  ;;  %3587 = vmatprep.subr.bf16.mxu1 %v3576_v25 }
  0x9f   : > { %3579 = vmatpush3.bf16.msra.mxu0 %v3576_v25  ;;  %3595 = vmatpush3.bf16.msra.mxu1 %v3576_v25  ;;  %v337_v25 = vld [vmem:[%s4237_s29 + $0x280] sm:$0xff] }
  0xa2   : > { %3405 = vmatmul.mubr.f32.vlgmr.msra.gmra.mrb[0].mxu0 %v258_v26  ;;  %3477 = vmatmul.mubr.f32.vlgmr.msra.gmra.mrb[0].mxu1 %v306_v27  ;;  %v290_v26 = vld [vmem:[%s4237_s29 + $0x108] sm:$0xff] }
  0xa3   : > { %3407 = vmatprep.mubr.f32.mxu0 %v259_v28  ;;  %3479 = vmatprep.mubr.f32.mxu1 %v307_v29  ;;  %v338_v27 = vld [vmem:[%s4237_s29 + $0x288] sm:$0xff]  ;;  %v291_v28 = vld [vmem:[%s4237_s29 + $0x110] sm:$0xff] }
  0xa4   : > { %v339_v29 = vld [vmem:[%s4237_s29 + $0x290] sm:$0xff] }
  0xa6   : > { %3408 = vmatmul.mubr.f32.gmra.mrb[2].mxu0 %v260_v30  ;;  %3480 = vmatmul.mubr.f32.gmra.mrb[2].mxu1 %v308_v31  ;;  %v292_v30 = vld [vmem:[%s4237_s29 + $0x118] sm:$0xff] }
  0xa7   : > { %3410 = vmatprep.mubr.f32.mxu0 %v261_v32  ;;  %3482 = vmatprep.mubr.f32.mxu1 %v309_v33  ;;  %v340_v31 = vld [vmem:[%s4237_s29 + $0x298] sm:$0xff]  ;;  %v293_v32 = vld [vmem:[%s4237_s29 + $0x120] sm:$0xff] }
  0xa8   : > { %v341_v33 = vld [vmem:[%s4237_s29 + $0x2a0] sm:$0xff] }
  0xaa   : > { %3411 = vmatmul.mubr.f32.gmra.mrb[4].mxu0 %v262_v34  ;;  %3483 = vmatmul.mubr.f32.gmra.mrb[4].mxu1 %v310_v35  ;;  %v294_v34 = vld [vmem:[%s4237_s29 + $0x128] sm:$0xff] }
  0xab   : > { %3413 = vmatprep.mubr.f32.mxu0 %v263_v36  ;;  %3485 = vmatprep.mubr.f32.mxu1 %v311_v37  ;;  %v342_v35 = vld [vmem:[%s4237_s29 + $0x2a8] sm:$0xff]  ;;  %v295_v36 = vld [vmem:[%s4237_s29 + $0x130] sm:$0xff] }
  0xac   : > { %v343_v37 = vld [vmem:[%s4237_s29 + $0x2b0] sm:$0xff] }
  0xae   : > { %3414 = vmatmul.mubr.f32.gmra.mrb[6].mxu0 %v264_v38  ;;  %3486 = vmatmul.mubr.f32.gmra.mrb[6].mxu1 %v312_v39  ;;  %v296_v38 = vld [vmem:[%s4237_s29 + $0x138] sm:$0xff] }
  0xaf   : > { %3416 = vmatprep.mubr.f32.mxu0 %v265_v40  ;;  %3488 = vmatprep.mubr.f32.mxu1 %v313_v41  ;;  %v344_v39 = vld [vmem:[%s4237_s29 + $0x2b8] sm:$0xff]  ;;  %v297_v40 = vld [vmem:[%s4237_s29 + $0x140] sm:$0xff] }
  0xb0   : > { %v345_v41 = vld [vmem:[%s4237_s29 + $0x2c0] sm:$0xff] }
  0xb2   : > { %3417 = vmatmul.mubr.f32.gmra.mrb[8].mxu0 %v266_v42  ;;  %3489 = vmatmul.mubr.f32.gmra.mrb[8].mxu1 %v314_v43  ;;  %v298_v42 = vld [vmem:[%s4237_s29 + $0x148] sm:$0xff] }
  0xb3   : > { %3419 = vmatprep.mubr.f32.mxu0 %v267_v44  ;;  %3491 = vmatprep.mubr.f32.mxu1 %v315_v45  ;;  %v346_v43 = vld [vmem:[%s4237_s29 + $0x2c8] sm:$0xff]  ;;  %v299_v44 = vld [vmem:[%s4237_s29 + $0x150] sm:$0xff] }
  0xb4   : > { %v347_v45 = vld [vmem:[%s4237_s29 + $0x2d0] sm:$0xff] }
  0xb6   : > { %3420 = vmatmul.mubr.f32.gmra.mrb[10].mxu0 %v268_v46  ;;  %3492 = vmatmul.mubr.f32.gmra.mrb[10].mxu1 %v316_v47  ;;  %v300_v46 = vld [vmem:[%s4237_s29 + $0x158] sm:$0xff] }
  0xb7   : > { %3422 = vmatprep.mubr.f32.mxu0 %v269_v48  ;;  %3494 = vmatprep.mubr.f32.mxu1 %v317_v49  ;;  %v348_v47 = vld [vmem:[%s4237_s29 + $0x2d8] sm:$0xff]  ;;  %v301_v48 = vld [vmem:[%s4237_s29 + $0x160] sm:$0xff] }
  0xb8   : > { %v349_v49 = vld [vmem:[%s4237_s29 + $0x2e0] sm:$0xff] }
  0xba   : > { %3423 = vmatmul.mubr.f32.gmra.mrb[12].mxu0 %v270_v50  ;;  %3495 = vmatmul.mubr.f32.gmra.mrb[12].mxu1 %v318_v51  ;;  %v302_v50 = vld [vmem:[%s4237_s29 + $0x168] sm:$0xff] }
  0xbb   : > { %3425 = vmatprep.mubr.f32.mxu0 %v271_v52  ;;  %3497 = vmatprep.mubr.f32.mxu1 %v319_v53  ;;  %v350_v51 = vld [vmem:[%s4237_s29 + $0x2e8] sm:$0xff]  ;;  %v303_v52 = vld [vmem:[%s4237_s29 + $0x170] sm:$0xff] }
  0xbc   : > { %v351_v53 = vld [vmem:[%s4237_s29 + $0x2f0] sm:$0xff] }
  0xbe   : > { %3426 = vmatmul.mubr.f32.gmra.mrb[14].mxu0 %v272_v54  ;;  %3498 = vmatmul.mubr.f32.gmra.mrb[14].mxu1 %v320_v55  ;;  %v304_v54 = vld [vmem:[%s4237_s29 + $0x178] sm:$0xff] }
  0xbf   : > { %3428 = vmatprep.mubr.f32.mxu0 %v273_v56  ;;  %3500 = vmatprep.mubr.f32.mxu1 %v321_v57  ;;  %v352_v55 = vld [vmem:[%s4237_s29 + $0x2f8] sm:$0xff]  ;;  %v4347_v56 = vld [vmem:[#allocation6] ss:$0 sm:$0xff] }
  0xc2   : > { %3429 = vmatmul.mubr.f32.gmra.mrb[16].mxu0 %v274_v58  ;;  %3501 = vmatmul.mubr.f32.gmra.mrb[16].mxu1 %v322_v59 }
  0xc3   : > { %3431 = vmatprep.mubr.f32.mxu0 %v275_v60  ;;  %3503 = vmatprep.mubr.f32.mxu1 %v323_v61 }
  0xc6   : > { %3432 = vmatmul.mubr.f32.gmra.mrb[18].mxu0 %v276_v62  ;;  %3504 = vmatmul.mubr.f32.gmra.mrb[18].mxu1 %v324_v63 }
  0xc7   : > { %3434 = vmatprep.mubr.f32.mxu0 %v277_v0  ;;  %3506 = vmatprep.mubr.f32.mxu1 %v325_v1 }
  0xca   : > { %3435 = vmatmul.mubr.f32.gmra.mrb[20].mxu0 %v278_v2  ;;  %3507 = vmatmul.mubr.f32.gmra.mrb[20].mxu1 %v326_v3 }
  0xcb   : > { %3437 = vmatprep.mubr.f32.mxu0 %v279_v4  ;;  %3509 = vmatprep.mubr.f32.mxu1 %v327_v5 }
  0xce   : > { %3438 = vmatmul.mubr.f32.gmra.mrb[22].mxu0 %v280_v6  ;;  %3510 = vmatmul.mubr.f32.gmra.mrb[22].mxu1 %v328_v7 }
  0xcf   : > { %3440 = vmatprep.mubr.f32.mxu0 %v281_v8  ;;  %3512 = vmatprep.mubr.f32.mxu1 %v329_v9 }
  0xd2   : > { %3441 = vmatmul.mubr.f32.gmra.mrb[24].mxu0 %v282_v10  ;;  %3513 = vmatmul.mubr.f32.gmra.mrb[24].mxu1 %v330_v11 }
  0xd3   : > { %3443 = vmatprep.mubr.f32.mxu0 %v283_v12  ;;  %3515 = vmatprep.mubr.f32.mxu1 %v331_v13  ;;  %v4367_v12 = vld [vmem:[#allocation7] ss:$0 sm:$0xff] }
  0xd6   : > { %3444 = vmatmul.mubr.f32.gmra.mrb[26].mxu0 %v284_v14  ;;  %3516 = vmatmul.mubr.f32.gmra.mrb[26].mxu1 %v332_v15 }
  0xd7   : > { %3446 = vmatprep.mubr.f32.mxu0 %v285_v16  ;;  %3518 = vmatprep.mubr.f32.mxu1 %v333_v17 }
  0xda   : > { %3447 = vmatmul.mubr.f32.gmra.mrb[28].mxu0 %v286_v18  ;;  %3519 = vmatmul.mubr.f32.gmra.mrb[28].mxu1 %v334_v19 }
  0xdb   : > { %3449 = vmatprep.mubr.f32.mxu0 %v287_v20  ;;  %3521 = vmatprep.mubr.f32.mxu1 %v335_v21 }
  0xde   : > { %3450 = vmatmul.mubr.f32.gmra.mrb[30].mxu0 %v288_v22  ;;  %3522 = vmatmul.mubr.f32.gmra.mrb[30].mxu1 %v336_v23 }
  0xdf   : > { %3452 = vmatprep.mubr.f32.mxu0 %v289_v24  ;;  %3524 = vmatprep.mubr.f32.mxu1 %v337_v25 }
  0xe2   : > { %3453 = vmatmul.mubr.f32.gmra.mrb[32].mxu0 %v290_v26  ;;  %3525 = vmatmul.mubr.f32.gmra.mrb[32].mxu1 %v338_v27 }
  0xe3   : > { %3455 = vmatprep.mubr.f32.mxu0 %v291_v28  ;;  %3527 = vmatprep.mubr.f32.mxu1 %v339_v29 }
  0xe6   : > { %3456 = vmatmul.mubr.f32.gmra.mrb[34].mxu0 %v292_v30  ;;  %3528 = vmatmul.mubr.f32.gmra.mrb[34].mxu1 %v340_v31 }
  0xe7   : > { %3458 = vmatprep.mubr.f32.mxu0 %v293_v32  ;;  %3530 = vmatprep.mubr.f32.mxu1 %v341_v33 }
  0xea   : > { %3459 = vmatmul.mubr.f32.gmra.mrb[36].mxu0 %v294_v34  ;;  %3531 = vmatmul.mubr.f32.gmra.mrb[36].mxu1 %v342_v35 }
  0xeb   : > { %3461 = vmatprep.mubr.f32.mxu0 %v295_v36  ;;  %3533 = vmatprep.mubr.f32.mxu1 %v343_v37 }
  0xee   : > { %3462 = vmatmul.mubr.f32.gmra.mrb[38].mxu0 %v296_v38  ;;  %3534 = vmatmul.mubr.f32.gmra.mrb[38].mxu1 %v344_v39 }
  0xef   : > { %3464 = vmatprep.mubr.f32.mxu0 %v297_v40  ;;  %3536 = vmatprep.mubr.f32.mxu1 %v345_v41 }
  0xf2   : > { %3465 = vmatmul.mubr.f32.gmra.mrb[40].mxu0 %v298_v42  ;;  %3537 = vmatmul.mubr.f32.gmra.mrb[40].mxu1 %v346_v43 }
  0xf3   : > { %3467 = vmatprep.mubr.f32.mxu0 %v299_v44  ;;  %3539 = vmatprep.mubr.f32.mxu1 %v347_v45 }
  0xf6   : > { %3468 = vmatmul.mubr.f32.gmra.mrb[42].mxu0 %v300_v46  ;;  %3540 = vmatmul.mubr.f32.gmra.mrb[42].mxu1 %v348_v47 }
  0xf7   : > { %3470 = vmatprep.mubr.f32.mxu0 %v301_v48  ;;  %3542 = vmatprep.mubr.f32.mxu1 %v349_v49 }
  0xfa   : > { %3471 = vmatmul.mubr.f32.gmra.mrb[44].mxu0 %v302_v50  ;;  %3543 = vmatmul.mubr.f32.gmra.mrb[44].mxu1 %v350_v51 }
  0xfb   : > { %3473 = vmatprep.mubr.f32.mxu0 %v303_v52  ;;  %3545 = vmatprep.mubr.f32.mxu1 %v351_v53 }
  0xfe   : > { %3474 = vmatmul.mubr.f32.gmra.mrb[46].mxu0 %v304_v54  ;;  %3546 = vmatmul.mubr.f32.gmra.mrb[46].mxu1 %v352_v55 }
 0x175   : > { %v3406_v57 = vpop.f32.mrb[0].mxu0  ;;  %v4349_v58 = vpop.f32.mrb[0].mxu1 }
 0x176   : > { %v442_v59 = vpop.f32.mrb[1].mxu0  ;;  %v4351_v60 = vpop.f32.mrb[1].mxu1  ;;  %v448_v61 = vadd.f32 %v3406_v57, %v4347_v56 }
 0x177   : > { %v443_v62 = vadd.f32 %v4347_v56, %v442_v59 }
 0x179   : > { %3670 = vtanh.f32 %v443_v62  ;;  %v3409_v63 = vpop.f32.mrb[2].mxu0  ;;  %v4355_v0 = vpop.f32.mrb[2].mxu1 }
 0x17a   : > { %v452_v1 = vpop.f32.mrb[3].mxu0  ;;  %v4357_v2 = vpop.f32.mrb[3].mxu1  ;;  %3672 = vtanh.f32 %v448_v61  ;;  %v458_v3 = vadd.f32 %v3409_v63, %v4347_v56 }
 0x17b   : > { %v453_v4 = vadd.f32 %v4347_v56, %v452_v1 }
 0x17d   : > { %3674 = vtanh.f32 %v453_v4  ;;  %v3412_v5 = vpop.f32.mrb[4].mxu0  ;;  %v4361_v6 = vpop.f32.mrb[4].mxu1 }
 0x17e   : > { %v462_v7 = vpop.f32.mrb[5].mxu0  ;;  %v4363_v8 = vpop.f32.mrb[5].mxu1  ;;  %3676 = vtanh.f32 %v458_v3  ;;  %v468_v9 = vadd.f32 %v3412_v5, %v4347_v56 }
 0x17f   : > { %v463_v10 = vadd.f32 %v4347_v56, %v462_v7 }
 0x181   : > { %3678 = vtanh.f32 %v463_v10  ;;  %v3415_v11 = vpop.f32.mrb[6].mxu0  ;;  %v4369_v13 = vpop.f32.mrb[6].mxu1 }
 0x182   : > { %v472_v14 = vpop.f32.mrb[7].mxu0  ;;  %v4371_v15 = vpop.f32.mrb[7].mxu1  ;;  %3680 = vtanh.f32 %v468_v9  ;;  %v478_v17 = vadd.f32 %v3415_v11, %v4347_v56 }
 0x183   : > { %v3671_v16 = vpop.eup %3670  ;;  %v473_v18 = vadd.f32 %v4347_v56, %v472_v14 }
 0x184   : > { %v1024_v19 = vmul.f32 %v3671_v16, %v4367_v12  ;;  %v3673_v20 = vpop.eup %3672 }
 0x185   : > { %3682 = vtanh.f32 %v473_v18  ;;  %v3418_v21 = vpop.f32.mrb[8].mxu0  ;;  %v4376_v22 = vpop.f32.mrb[8].mxu1  ;;  %v1025_v29 = vmul.f32 %v3673_v20, %v4367_v12 }
 0x186   : > { %1120 = vadd.xlane.f32.xlu0 %v1024_v19  ;;  %v482_v23 = vpop.f32.mrb[9].mxu0  ;;  %v4378_v24 = vpop.f32.mrb[9].mxu1  ;;  %3684 = vtanh.f32 %v478_v17  ;;  %v488_v26 = vadd.f32 %v3418_v21, %v4347_v56 }
 0x187   : > { %v3675_v25 = vpop.eup %3674  ;;  %v483_v27 = vadd.f32 %v4347_v56, %v482_v23 }
 0x188   : > { %v1026_v28 = vmul.f32 %v3675_v25, %v4367_v12  ;;  %v3677_v30 = vpop.eup %3676 }
 0x189   : > { %3686 = vtanh.f32 %v483_v27  ;;  %v3421_v31 = vpop.f32.mrb[10].mxu0  ;;  %v4384_v32 = vpop.f32.mrb[10].mxu1  ;;  %v1027_v38 = vmul.f32 %v3677_v30, %v4367_v12 }
 0x18a   : > { %1124 = vadd.xlane.f32.xlu1 %v1026_v28  ;;  %1122 = vadd.xlane.f32.xlu0 %v1025_v29  ;;  %v492_v33 = vpop.f32.mrb[11].mxu0  ;;  %v4386_v34 = vpop.f32.mrb[11].mxu1  ;;  %3688 = vtanh.f32 %v488_v26  ;;  %v498_v36 = vadd.f32 %v3421_v31, %v4347_v56 }
 0x18b   : > { %v3679_v35 = vpop.eup %3678  ;;  %v493_v37 = vadd.f32 %v4347_v56, %v492_v33 }
 0x18c   : > { %v1028_v39 = vmul.f32 %v3679_v35, %v4367_v12  ;;  %v3681_v40 = vpop.eup %3680 }
 0x18d   : > { %3690 = vtanh.f32 %v493_v37  ;;  %v3424_v41 = vpop.f32.mrb[12].mxu0  ;;  %v4392_v42 = vpop.f32.mrb[12].mxu1  ;;  %v1029_v48 = vmul.f32 %v3681_v40, %v4367_v12 }
 0x18e   : > { %1126 = vadd.xlane.f32.xlu1 %v1027_v38  ;;  %v502_v43 = vpop.f32.mrb[13].mxu0  ;;  %1128 = vadd.xlane.f32.xlu0 %v1028_v39  ;;  %v4394_v44 = vpop.f32.mrb[13].mxu1  ;;  %3692 = vtanh.f32 %v498_v36  ;;  %v508_v46 = vadd.f32 %v3424_v41, %v4347_v56 }
 0x18f   : > { %v3683_v45 = vpop.eup %3682  ;;  %v503_v47 = vadd.f32 %v4347_v56, %v502_v43 }
 0x190   : > { %v1030_v49 = vmul.f32 %v3683_v45, %v4367_v12  ;;  %v3685_v50 = vpop.eup %3684 }
 0x191   : > { %3694 = vtanh.f32 %v503_v47  ;;  %v3427_v51 = vpop.f32.mrb[14].mxu0  ;;  %v4400_v52 = vpop.f32.mrb[14].mxu1  ;;  %v1031_v61 = vmul.f32 %v3685_v50, %v4367_v12 }
 0x192   : > { %1130 = vadd.xlane.f32.xlu1 %v1029_v48  ;;  %v512_v53 = vpop.f32.mrb[15].mxu0  ;;  %1132 = vadd.xlane.f32.xlu0 %v1030_v49  ;;  %v4402_v54 = vpop.f32.mrb[15].mxu1  ;;  %3696 = vtanh.f32 %v508_v46  ;;  %v518_v57 = vadd.f32 %v3427_v51, %v4347_v56 }
 0x193   : > { %v3687_v55 = vpop.eup %3686  ;;  %v513_v59 = vadd.f32 %v4347_v56, %v512_v53 }
 0x194   : > { %v1032_v62 = vmul.f32 %v3687_v55, %v4367_v12  ;;  %v3689_v63 = vpop.eup %3688 }
 0x195   : > { %3698 = vtanh.f32 %v513_v59  ;;  %v3430_v1 = vpop.f32.mrb[16].mxu0  ;;  %v4408_v3 = vpop.f32.mrb[16].mxu1  ;;  %v1033_v11 = vmul.f32 %v3689_v63, %v4367_v12 }
 0x196   : > { %1134 = vadd.xlane.f32.xlu1 %v1031_v61  ;;  %v522_v4 = vpop.f32.mrb[17].mxu0  ;;  %1136 = vadd.xlane.f32.xlu0 %v1032_v62  ;;  %v4410_v5 = vpop.f32.mrb[17].mxu1  ;;  %3700 = vtanh.f32 %v518_v57  ;;  %v528_v9 = vadd.f32 %v3430_v1, %v4347_v56 }
 0x197   : > { %v3691_v7 = vpop.eup %3690  ;;  %v523_v10 = vadd.f32 %v4347_v56, %v522_v4 }
 0x198   : > { %v1034_v14 = vmul.f32 %v3691_v7, %v4367_v12  ;;  %v3693_v16 = vpop.eup %3692 }
 0x199   : > { %3702 = vtanh.f32 %v523_v10  ;;  %v3433_v17 = vpop.f32.mrb[18].mxu0  ;;  %v4416_v18 = vpop.f32.mrb[18].mxu1  ;;  %v1035_v26 = vmul.f32 %v3693_v16, %v4367_v12 }
 0x19a   : > { %1138 = vadd.xlane.f32.xlu1 %v1033_v11  ;;  %v532_v19 = vpop.f32.mrb[19].mxu0  ;;  %1140 = vadd.xlane.f32.xlu0 %v1034_v14  ;;  %v4418_v20 = vpop.f32.mrb[19].mxu1  ;;  %3704 = vtanh.f32 %v528_v9  ;;  %v538_v23 = vadd.f32 %v3433_v17, %v4347_v56 }
 0x19b   : > { %v3695_v21 = vpop.eup %3694  ;;  %v533_v25 = vadd.f32 %v4347_v56, %v532_v19 }
 0x19c   : > { %v1036_v27 = vmul.f32 %v3695_v21, %v4367_v12  ;;  %v3697_v28 = vpop.eup %3696 }
 0x19d   : > { %3706 = vtanh.f32 %v533_v25  ;;  %v3436_v29 = vpop.f32.mrb[20].mxu0  ;;  %v4424_v30 = vpop.f32.mrb[20].mxu1  ;;  %v1037_v38 = vmul.f32 %v3697_v28, %v4367_v12 }
 0x19e   : > { %1142 = vadd.xlane.f32.xlu1 %v1035_v26  ;;  %v542_v31 = vpop.f32.mrb[21].mxu0  ;;  %1144 = vadd.xlane.f32.xlu0 %v1036_v27  ;;  %v4426_v33 = vpop.f32.mrb[21].mxu1  ;;  %3708 = vtanh.f32 %v538_v23  ;;  %v548_v36 = vadd.f32 %v3436_v29, %v4347_v56 }
 0x19f   : > { %v3699_v35 = vpop.eup %3698  ;;  %v543_v37 = vadd.f32 %v4347_v56, %v542_v31 }
 0x1a0   : > { %v1038_v39 = vmul.f32 %v3699_v35, %v4367_v12  ;;  %v3701_v40 = vpop.eup %3700 }
 0x1a1   : > { %3710 = vtanh.f32 %v543_v37  ;;  %v3439_v41 = vpop.f32.mrb[22].mxu0  ;;  %v4432_v43 = vpop.f32.mrb[22].mxu1  ;;  %v1039_v50 = vmul.f32 %v3701_v40, %v4367_v12 }
 0x1a2   : > { %1146 = vadd.xlane.f32.xlu1 %v1037_v38  ;;  %v552_v45 = vpop.f32.mrb[23].mxu0  ;;  %1148 = vadd.xlane.f32.xlu0 %v1038_v39  ;;  %v4434_v46 = vpop.f32.mrb[23].mxu1  ;;  %3712 = vtanh.f32 %v548_v36  ;;  %v558_v48 = vadd.f32 %v3439_v41, %v4347_v56 }
 0x1a3   : > { %v3703_v47 = vpop.eup %3702  ;;  %v553_v49 = vadd.f32 %v4347_v56, %v552_v45 }
 0x1a4   : > { %v1040_v51 = vmul.f32 %v3703_v47, %v4367_v12  ;;  %v3705_v53 = vpop.eup %3704 }
 0x1a5   : > { %3714 = vtanh.f32 %v553_v49  ;;  %v3442_v55 = vpop.f32.mrb[24].mxu0  ;;  %v4440_v57 = vpop.f32.mrb[24].mxu1  ;;  %v1041_v4 = vmul.f32 %v3705_v53, %v4367_v12 }
 0x1a6   : > { %1150 = vadd.xlane.f32.xlu1 %v1039_v50  ;;  %v562_v59 = vpop.f32.mrb[25].mxu0  ;;  %1152 = vadd.xlane.f32.xlu0 %v1040_v51  ;;  %v4442_v61 = vpop.f32.mrb[25].mxu1  ;;  %3716 = vtanh.f32 %v558_v48  ;;  %v568_v63 = vadd.f32 %v3442_v55, %v4347_v56 }
 0x1a7   : > { %v3707_v62 = vpop.eup %3706  ;;  %v563_v1 = vadd.f32 %v4347_v56, %v562_v59 }
 0x1a8   : > { %v1042_v7 = vmul.f32 %v3707_v62, %v4367_v12  ;;  %v3709_v9 = vpop.eup %3708 }
 0x1a9   : > { %3718 = vtanh.f32 %v563_v1  ;;  %v3445_v10 = vpop.f32.mrb[26].mxu0  ;;  %v4448_v11 = vpop.f32.mrb[26].mxu1  ;;  %v1043_v23 = vmul.f32 %v3709_v9, %v4367_v12 }
 0x1aa   : > { %1154 = vadd.xlane.f32.xlu1 %v1041_v4  ;;  %v572_v14 = vpop.f32.mrb[27].mxu0  ;;  %1156 = vadd.xlane.f32.xlu0 %v1042_v7  ;;  %v4450_v16 = vpop.f32.mrb[27].mxu1  ;;  %3720 = vtanh.f32 %v568_v63  ;;  %v578_v19 = vadd.f32 %v3445_v10, %v4347_v56 }
 0x1ab   : > { %v3711_v17 = vpop.eup %3710  ;;  %v573_v21 = vadd.f32 %v4347_v56, %v572_v14 }
 0x1ac   : > { %v1044_v25 = vmul.f32 %v3711_v17, %v4367_v12  ;;  %v3713_v26 = vpop.eup %3712 }
 0x1ad   : > { %3722 = vtanh.f32 %v573_v21  ;;  %v3448_v27 = vpop.f32.mrb[28].mxu0  ;;  %v4456_v28 = vpop.f32.mrb[28].mxu1  ;;  %v1045_v38 = vmul.f32 %v3713_v26, %v4367_v12 }
 0x1ae   : > { %1158 = vadd.xlane.f32.xlu1 %v1043_v23  ;;  %v582_v29 = vpop.f32.mrb[29].mxu0  ;;  %1160 = vadd.xlane.f32.xlu0 %v1044_v25  ;;  %v4458_v31 = vpop.f32.mrb[29].mxu1  ;;  %3724 = vtanh.f32 %v578_v19  ;;  %v588_v36 = vadd.f32 %v3448_v27, %v4347_v56 }
 0x1af   : > { %v3715_v35 = vpop.eup %3714  ;;  %v583_v37 = vadd.f32 %v4347_v56, %v582_v29 }
 0x1b0   : > { %v1046_v39 = vmul.f32 %v3715_v35, %v4367_v12  ;;  %v3717_v40 = vpop.eup %3716 }
 0x1b1   : > { %3726 = vtanh.f32 %v583_v37  ;;  %v3451_v41 = vpop.f32.mrb[30].mxu0  ;;  %v4464_v45 = vpop.f32.mrb[30].mxu1  ;;  %v1047_v53 = vmul.f32 %v3717_v40, %v4367_v12 }
 0x1b2   : > { %1162 = vadd.xlane.f32.xlu1 %v1045_v38  ;;  %v592_v47 = vpop.f32.mrb[31].mxu0  ;;  %1164 = vadd.xlane.f32.xlu0 %v1046_v39  ;;  %v4466_v48 = vpop.f32.mrb[31].mxu1  ;;  %3728 = vtanh.f32 %v588_v36  ;;  %v598_v50 = vadd.f32 %v3451_v41, %v4347_v56 }
 0x1b3   : > { %v3719_v49 = vpop.eup %3718  ;;  %v593_v51 = vadd.f32 %v4347_v56, %v592_v47 }
 0x1b4   : > { %v1048_v55 = vmul.f32 %v3719_v49, %v4367_v12  ;;  %v3721_v59 = vpop.eup %3720 }
 0x1b5   : > { %3730 = vtanh.f32 %v593_v51  ;;  %v3454_v62 = vpop.f32.mrb[32].mxu0  ;;  %v4472_v63 = vpop.f32.mrb[32].mxu1  ;;  %v1049_v14 = vmul.f32 %v3721_v59, %v4367_v12 }
 0x1b6   : > { %1166 = vadd.xlane.f32.xlu1 %v1047_v53  ;;  %v602_v1 = vpop.f32.mrb[33].mxu0  ;;  %1168 = vadd.xlane.f32.xlu0 %v1048_v55  ;;  %v4474_v4 = vpop.f32.mrb[33].mxu1  ;;  %3732 = vtanh.f32 %v598_v50  ;;  %v608_v9 = vadd.f32 %v3454_v62, %v4347_v56 }
 0x1b7   : > { %v3723_v7 = vpop.eup %3722  ;;  %v603_v10 = vadd.f32 %v4347_v56, %v602_v1 }
 0x1b8   : > { %v1050_v17 = vmul.f32 %v3723_v7, %v4367_v12  ;;  %v3725_v19 = vpop.eup %3724 }
 0x1b9   : > { %3734 = vtanh.f32 %v603_v10  ;;  %v3457_v21 = vpop.f32.mrb[34].mxu0  ;;  %v4480_v23 = vpop.f32.mrb[34].mxu1  ;;  %v1051_v36 = vmul.f32 %v3725_v19, %v4367_v12 }
 0x1ba   : > { %1170 = vadd.xlane.f32.xlu1 %v1049_v14  ;;  %v612_v25 = vpop.f32.mrb[35].mxu0  ;;  %1172 = vadd.xlane.f32.xlu0 %v1050_v17  ;;  %v4482_v26 = vpop.f32.mrb[35].mxu1  ;;  %3736 = vtanh.f32 %v608_v9  ;;  %v618_v29 = vadd.f32 %v3457_v21, %v4347_v56 }
 0x1bb   : > { %v3727_v27 = vpop.eup %3726  ;;  %v613_v35 = vadd.f32 %v4347_v56, %v612_v25 }
 0x1bc   : > { %v1052_v37 = vmul.f32 %v3727_v27, %v4367_v12  ;;  %v3729_v38 = vpop.eup %3728 }
 0x1bd   : > { %3738 = vtanh.f32 %v613_v35  ;;  %v3460_v39 = vpop.f32.mrb[36].mxu0  ;;  %v4488_v40 = vpop.f32.mrb[36].mxu1  ;;  %v1053_v53 = vmul.f32 %v3729_v38, %v4367_v12 }
 0x1be   : > { %1174 = vadd.xlane.f32.xlu1 %v1051_v36  ;;  %v622_v41 = vpop.f32.mrb[37].mxu0  ;;  %1176 = vadd.xlane.f32.xlu0 %v1052_v37  ;;  %v4490_v47 = vpop.f32.mrb[37].mxu1  ;;  %3740 = vtanh.f32 %v618_v29  ;;  %v628_v50 = vadd.f32 %v3460_v39, %v4347_v56 }
 0x1bf   : > { %v3731_v49 = vpop.eup %3730  ;;  %v623_v51 = vadd.f32 %v4347_v56, %v622_v41 }
 0x1c0   : > { %v1054_v55 = vmul.f32 %v3731_v49, %v4367_v12  ;;  %v3733_v59 = vpop.eup %3732 }
 0x1c1   : > { %3742 = vtanh.f32 %v623_v51  ;;  %v3463_v62 = vpop.f32.mrb[38].mxu0  ;;  %v4496_v1 = vpop.f32.mrb[38].mxu1  ;;  %v1055_v19 = vmul.f32 %v3733_v59, %v4367_v12 }
 0x1c2   : > { %1178 = vadd.xlane.f32.xlu1 %v1053_v53  ;;  %v632_v7 = vpop.f32.mrb[39].mxu0  ;;  %1180 = vadd.xlane.f32.xlu0 %v1054_v55  ;;  %v4498_v9 = vpop.f32.mrb[39].mxu1  ;;  %3744 = vtanh.f32 %v628_v50  ;;  %v638_v14 = vadd.f32 %v3463_v62, %v4347_v56 }
 0x1c3   : > { %v3735_v10 = vpop.eup %3734  ;;  %v633_v17 = vadd.f32 %v4347_v56, %v632_v7 }
 0x1c4   : > { %v1056_v21 = vmul.f32 %v3735_v10, %v4367_v12  ;;  %v3737_v25 = vpop.eup %3736 }
 0x1c5   : > { %3746 = vtanh.f32 %v633_v17  ;;  %v3466_v27 = vpop.f32.mrb[40].mxu0  ;;  %v4504_v29 = vpop.f32.mrb[40].mxu1  ;;  %v1057_v41 = vmul.f32 %v3737_v25, %v4367_v12 }
 0x1c6   : > { %1182 = vadd.xlane.f32.xlu1 %v1055_v19  ;;  %v642_v35 = vpop.f32.mrb[41].mxu0  ;;  %1184 = vadd.xlane.f32.xlu0 %v1056_v21  ;;  %v4506_v36 = vpop.f32.mrb[41].mxu1  ;;  %3748 = vtanh.f32 %v638_v14  ;;  %v648_v38 = vadd.f32 %v3466_v27, %v4347_v56 }
 0x1c7   : > { %v3739_v37 = vpop.eup %3738  ;;  %v643_v39 = vadd.f32 %v4347_v56, %v642_v35 }
 0x1c8   : > { %v1058_v49 = vmul.f32 %v3739_v37, %v4367_v12  ;;  %v3741_v50 = vpop.eup %3740 }
 0x1c9   : > { %3750 = vtanh.f32 %v643_v39  ;;  %v3469_v51 = vpop.f32.mrb[42].mxu0  ;;  %v4512_v53 = vpop.f32.mrb[42].mxu1  ;;  %v1059_v14 = vmul.f32 %v3741_v50, %v4367_v12  ;;  %v683_v50 = vadd.f32 %v4347_v56, %v4351_v60 }
 0x1ca   : > { %1186 = vadd.xlane.f32.xlu1 %v1057_v41  ;;  %v652_v55 = vpop.f32.mrb[43].mxu0  ;;  %1188 = vadd.xlane.f32.xlu0 %v1058_v49  ;;  %v4514_v59 = vpop.f32.mrb[43].mxu1  ;;  %3752 = vtanh.f32 %v648_v38  ;;  %v658_v7 = vadd.f32 %v3469_v51, %v4347_v56 }
 0x1cb   : > { %v3743_v62 = vpop.eup %3742  ;;  %v653_v10 = vadd.f32 %v4347_v56, %v652_v55 }
 0x1cc   : > { %v1060_v17 = vmul.f32 %v3743_v62, %v4367_v12  ;;  %v3745_v19 = vpop.eup %3744 }
 0x1cd   : > { %3754 = vtanh.f32 %v653_v10  ;;  %v3472_v21 = vpop.f32.mrb[44].mxu0  ;;  %v4520_v25 = vpop.f32.mrb[44].mxu1  ;;  %v1061_v41 = vmul.f32 %v3745_v19, %v4367_v12 }
 0x1ce   : > { %1190 = vadd.xlane.f32.xlu1 %v1059_v14  ;;  %v662_v27 = vpop.f32.mrb[45].mxu0  ;;  %1192 = vadd.xlane.f32.xlu0 %v1060_v17  ;;  %v4522_v35 = vpop.f32.mrb[45].mxu1  ;;  %3756 = vtanh.f32 %v658_v7  ;;  %v668_v38 = vadd.f32 %v3472_v21, %v4347_v56 }
 0x1cf   : > { %v3747_v37 = vpop.eup %3746  ;;  %v663_v39 = vadd.f32 %v4347_v56, %v662_v27 }
 0x1d0   : > { %v1062_v49 = vmul.f32 %v3747_v37, %v4367_v12  ;;  %v3749_v51 = vpop.eup %3748  ;;  %v693_v37 = vadd.f32 %v4347_v56, %v4357_v2  ;;  %v698_v2 = vadd.f32 %v4355_v0, %v4347_v56 }
 0x1d1   : > { %3758 = vtanh.f32 %v663_v39  ;;  %v3475_v55 = vpop.f32.mrb[46].mxu0  ;;  %v4530_v62 = vpop.f32.mrb[46].mxu1  ;;  %v1063_v21 = vmul.f32 %v3749_v51, %v4367_v12 }
 0x1d2   : > { %1194 = vadd.xlane.f32.xlu1 %v1061_v41  ;;  %v672_v10 = vpop.f32.mrb[47].mxu0  ;;  %1196 = vadd.xlane.f32.xlu0 %v1062_v49  ;;  %v4532_v7 = vpop.f32.mrb[47].mxu1  ;;  %3760 = vtanh.f32 %v668_v38  ;;  %v678_v17 = vadd.f32 %v3475_v55, %v4347_v56  ;;  %v688_v38 = vadd.f32 %v4349_v58, %v4347_v56 }
 0x1d3   : > { %v3751_v14 = vpop.eup %3750  ;;  %v673_v19 = vadd.f32 %v4347_v56, %v672_v10  ;;  %3762 = vtanh.f32 %v683_v50  ;;  %v703_v50 = vadd.f32 %v4347_v56, %v4363_v8 }
 0x1d4   : > { %v1064_v60 = vmul.f32 %v3751_v14, %v4367_v12  ;;  %v3753_v27 = vpop.eup %3752 }
 0x1d5   : > { %3764 = vtanh.f32 %v673_v19  ;;  %v1065_v41 = vmul.f32 %v3753_v27, %v4367_v12 }
 0x1d6   : > { %1198 = vadd.xlane.f32.xlu1 %v1063_v21  ;;  %1200 = vadd.xlane.f32.xlu0 %v1064_v60  ;;  %3766 = vtanh.f32 %v678_v17  ;;  %v713_v17 = vadd.f32 %v4347_v56, %v4371_v15  ;;  %v708_v21 = vadd.f32 %v4361_v6, %v4347_v56 }
 0x1d7   : > { %v3755_v39 = vpop.eup %3754  ;;  %3768 = vtanh.f32 %v693_v37  ;;  %v723_v37 = vadd.f32 %v4347_v56, %v4378_v24 }
 0x1d8   : > { %v1066_v49 = vmul.f32 %v3755_v39, %v4367_v12  ;;  %v3757_v51 = vpop.eup %3756  ;;  %3770 = vtanh.f32 %v688_v38  ;;  %v718_v38 = vadd.f32 %v4369_v13, %v4347_v56  ;;  %v743_v13 = vadd.f32 %v4347_v56, %v4394_v44 }
 0x1d9   : > { %v1067_v10 = vmul.f32 %v3757_v51, %v4367_v12  ;;  %3772 = vtanh.f32 %v703_v50  ;;  %v728_v50 = vadd.f32 %v4376_v22, %v4347_v56  ;;  %v753_v22 = vadd.f32 %v4347_v56, %v4402_v54 }
 0x1da   : > { %1202 = vadd.xlane.f32.xlu1 %v1065_v41  ;;  %1204 = vadd.xlane.f32.xlu0 %v1066_v49  ;;  %3774 = vtanh.f32 %v698_v2  ;;  %v733_v49 = vadd.f32 %v4347_v56, %v4386_v34 }
 0x1db   : > { %v3759_v55 = vpop.eup %3758  ;;  %3776 = vtanh.f32 %v713_v17 }
 0x1dc   : > { %v1068_v58 = vmul.f32 %v3759_v55, %v4367_v12  ;;  %v3761_v14 = vpop.eup %3760  ;;  %3778 = vtanh.f32 %v708_v21 }
 0x1dd   : > { %v3763_v19 = vpop.eup %3762  ;;  %v1069_v60 = vmul.f32 %v3761_v14, %v4367_v12  ;;  %3780 = vtanh.f32 %v723_v37 }
 0x1de   : > { %1206 = vadd.xlane.f32.xlu1 %v1067_v10  ;;  %1208 = vadd.xlane.f32.xlu0 %v1068_v58  ;;  %v1072_v15 = vmul.f32 %v3763_v19, %v4367_v12  ;;  %3782 = vtanh.f32 %v718_v38  ;;  %v738_v58 = vadd.f32 %v4384_v32, %v4347_v56  ;;  %v763_v32 = vadd.f32 %v4347_v56, %v4410_v5 }
 0x1df   : > { %v3765_v8 = vpop.eup %3764  ;;  %3784 = vtanh.f32 %v733_v49  ;;  %v768_v38 = vadd.f32 %v4408_v3, %v4347_v56 }
 0x1e0   : > { %v1070_v0 = vmul.f32 %v3765_v8, %v4367_v12  ;;  %v3767_v27 = vpop.eup %3766  ;;  %3786 = vtanh.f32 %v728_v50  ;;  %v748_v8 = vadd.f32 %v4392_v42, %v4347_v56  ;;  %v773_v42 = vadd.f32 %v4347_v56, %v4418_v20 }
 0x1e1   : > { %v3769_v39 = vpop.eup %3768  ;;  %v1071_v6 = vmul.f32 %v3767_v27, %v4367_v12  ;;  %3788 = vtanh.f32 %v743_v13  ;;  %v758_v27 = vadd.f32 %v4400_v52, %v4347_v56  ;;  %v783_v52 = vadd.f32 %v4347_v56, %v4426_v33 }
 0x1e2   : > { %1210 = vadd.xlane.f32.xlu1 %v1069_v60  ;;  %1212 = vadd.xlane.f32.xlu0 %v1070_v0  ;;  %v3771_v41 = vpop.eup %3770  ;;  %v1074_v24 = vmul.f32 %v3769_v39, %v4367_v12  ;;  %3790 = vtanh.f32 %v738_v58  ;;  %v793_v33 = vadd.f32 %v4347_v56, %v4434_v46  ;;  %v818_v46 = vadd.f32 %v4448_v11, %v4347_v56 }
 0x1e3   : > { %v3773_v51 = vpop.eup %3772  ;;  %v1073_v55 = vmul.f32 %v3771_v41, %v4367_v12  ;;  %3792 = vtanh.f32 %v753_v22  ;;  %v1314_v58 = vlaneseq  ;;  %v823_v11 = vadd.f32 %v4347_v56, %v4458_v31 }
 0x1e4   : > { %v3775_v2 = vpop.eup %3774  ;;  %v1076_v34 = vmul.f32 %v3773_v51, %v4367_v12  ;;  %3794 = vtanh.f32 %v748_v8  ;;  %v788_v51 = vadd.f32 %v4424_v30, %v4347_v56  ;;  %v848_v31 = vadd.f32 %v4472_v63, %v4347_v56 }
 0x1e5   : > { %v3777_v10 = vpop.eup %3776  ;;  %v1075_v14 = vmul.f32 %v3775_v2, %v4367_v12  ;;  %3796 = vtanh.f32 %v763_v32 }
 0x1e6   : > { %1214 = vadd.xlane.f32.xlu1 %v1071_v6  ;;  %1216 = vadd.xlane.f32.xlu0 %v1072_v15  ;;  %v3779_v17 = vpop.eup %3778  ;;  %v1078_v44 = vmul.f32 %v3777_v10, %v4367_v12  ;;  %3798 = vtanh.f32 %v758_v27  ;;  %v843_v27 = vadd.f32 %v4347_v56, %v4474_v4 }
 0x1e7   : > { %v3781_v19 = vpop.eup %3780  ;;  %v1077_v21 = vmul.f32 %v3779_v17, %v4367_v12  ;;  %3800 = vtanh.f32 %v773_v42  ;;  %v4650_v42 = vand.u32 127, %v1314_v58 }
 0x1e8   : > { %v3783_v60 = vpop.eup %3782  ;;  %v1080_v54 = vmul.f32 %v3781_v19, %v4367_v12  ;;  %3802 = vtanh.f32 %v768_v38  ;;  %v4628_v19 = vshrl.u32 %v1314_v58, 7 }
 0x1e9   : > { %v3785_v0 = vpop.eup %3784  ;;  %v1079_v37 = vmul.f32 %v3783_v60, %v4367_v12  ;;  %3804 = vtanh.f32 %v783_v52  ;;  %v858_v52 = vadd.f32 %v4480_v23, %v4347_v56 }
 0x1ea   : > { %1218 = vadd.xlane.f32.xlu1 %v1073_v55  ;;  %1220 = vadd.xlane.f32.xlu0 %v1074_v24  ;;  %v3787_v15 = vpop.eup %3786  ;;  %v1082_v5 = vmul.f32 %v3785_v0, %v4367_v12  ;;  %v778_v24 = vadd.f32 %v4416_v18, %v4347_v56  ;;  %v798_v55 = vadd.f32 %v4432_v43, %v4347_v56  ;;  %v4637_v60 = vadd.s32 8, %v4628_v19 }
 0x1eb   : > { %v3789_v39 = vpop.eup %3788  ;;  %v1081_v6 = vmul.f32 %v3787_v15, %v4367_v12  ;;  %v808_v18 = vadd.f32 %v4440_v57, %v4347_v56  ;;  %v813_v57 = vadd.f32 %v4347_v56, %v4450_v16 }
 0x1ec   : > { %v3791_v41 = vpop.eup %3790  ;;  %v1084_v20 = vmul.f32 %v3789_v39, %v4367_v12  ;;  %3806 = vtanh.f32 %v778_v24  ;;  %v4665_v24 = vadd.s32 48, %v4628_v19 }
 0x1ed   : > { %v3793_v49 = vpop.eup %3792  ;;  %v1083_v3 = vmul.f32 %v3791_v41, %v4367_v12  ;;  %3808 = vtanh.f32 %v788_v51  ;;  %v1617_v41 = vand.u32 3, %v4637_v60 }
 0x1ee   : > { %1222 = vadd.xlane.f32.xlu1 %v1075_v14  ;;  %1224 = vadd.xlane.f32.xlu0 %v1076_v34  ;;  %v3795_v50 = vpop.eup %3794  ;;  %v1086_v2 = vmul.f32 %v3793_v49, %v4367_v12  ;;  %v803_v34 = vadd.f32 %v4347_v56, %v4442_v61  ;;  %3810 = vtanh.f32 %v793_v33  ;;  %v828_v61 = vadd.f32 %v4456_v28, %v4347_v56 }
 0x1ef   : > { %v3797_v13 = vpop.eup %3796  ;;  %v1085_v30 = vmul.f32 %v3795_v50, %v4367_v12  ;;  %3812 = vtanh.f32 %v798_v55  ;;  %v833_v28 = vadd.f32 %v4347_v56, %v4466_v48  ;;  %v4642_v48 = vadd.s32 24, %v4628_v19 }
 0x1f0   : > { %v3799_v10 = vpop.eup %3798  ;;  %v1088_v43 = vmul.f32 %v3797_v13, %v4367_v12  ;;  %3814 = vtanh.f32 %v808_v18  ;;  %v4662_v49 = vadd.s32 40, %v4628_v19  ;;  %v853_v50 = vadd.f32 %v4347_v56, %v4482_v26 }
 0x1f1   : > { %v3801_v14 = vpop.eup %3800  ;;  %v1087_v17 = vmul.f32 %v3799_v10, %v4367_v12  ;;  %3816 = vtanh.f32 %v803_v34  ;;  %vm4690_vm6 = vcmp.eq.s32.totalorder %v1617_v41, %v4650_v42  ;;  %v1343_v18 = vadd.s32 224, %v4628_v19 }
 0x1f2   : > { %1226 = vadd.xlane.f32.xlu1 %v1077_v21  ;;  %1228 = vadd.xlane.f32.xlu0 %v1078_v44  ;;  %v3803_v22 = vpop.eup %3802  ;;  %3818 = vtanh.f32 %v818_v46  ;;  %v838_v44 = vadd.f32 %v4464_v45, %v4347_v56  ;;  %v1090_v16 = vmul.f32 %v3801_v14, %v4367_v12  ;;  %v4634_v45 = vadd.s32 16, %v4628_v19 }
 0x1f3   : > { %3820 = vtanh.f32 %v813_v57  ;;  %v3805_v8 = vpop.eup %3804  ;;  %v1089_v21 = vmul.f32 %v3803_v22, %v4367_v12  ;;  %v1645_v10 = vand.u32 3, %v4662_v49  ;;  %v1652_v46 = vand.u32 3, %v4665_v24 }
 0x1f4   : > { %3822 = vtanh.f32 %v828_v61  ;;  %v1092_v63 = vmul.f32 %v3805_v8, %v4367_v12  ;;  %v4722_v22 = vadd.s32 80, %v4628_v19 }
 0x1f5   : > { %3824 = vtanh.f32 %v823_v11  ;;  %vm4753_vm13 = vcmp.eq.s32.totalorder %v1645_v10, %v4650_v42  ;;  %vm4759_vm14 = vcmp.eq.s32.totalorder %v1652_v46, %v4650_v42 }
 0x1f6   : > { %1230 = vadd.xlane.f32.xlu1 %v1079_v37  ;;  %1232 = vadd.xlane.f32.xlu0 %v1080_v54  ;;  %v3807_v32 = vpop.eup %3806  ;;  %3826 = vtanh.f32 %v838_v44  ;;  %v4639_v54 = vstv %s1313_s20  ;;  %v4648_v37 = vadd.s32 32, %v4628_v19 }
 0x1f7   : > { %v3809_v0 = vpop.eup %3808  ;;  %3828 = vtanh.f32 %v833_v28  ;;  %v1091_v38 = vmul.f32 %v3807_v32, %v4367_v12  ;;  %vm1412_vm0 = vcmp.lt.s32.totalorder %v4628_v19, %v4639_v54  ;;  %vm1414_vm3 = vcmp.lt.s32.totalorder %v4634_v45, %v4639_v54 }
 0x1f8   : > { %v3811_v15 = vpop.eup %3810  ;;  %3830 = vtanh.f32 %v848_v31  ;;  %v1638_v33 = vand.u32 3, %v4648_v37  ;;  %vm1413_vm4 = vcmp.lt.s32.totalorder %v4637_v60, %v4639_v54  ;;  %v1093_v56 = vmul.f32 %v3809_v0, %v4367_v12 }
 0x1f9   : > { %v3813_v39 = vpop.eup %3812  ;;  %3832 = vtanh.f32 %v843_v27  ;;  %vm1415_vm7 = vcmp.lt.s32.totalorder %v4642_v48, %v4639_v54  ;;  %vm1416_vm8 = vcmp.lt.s32.totalorder %v4648_v37, %v4639_v54  ;;  %vm1417_vm11 = vcmp.lt.s32.totalorder %v4662_v49, %v4639_v54 }
 0x1fa   : > { %1234 = vadd.xlane.f32.xlu1 %v1081_v6  ;;  %1236 = vadd.xlane.f32.xlu0 %v1082_v5  ;;  %v1610_v5 = vand.u32 3, %v4628_v19  ;;  %v1624_v6 = vand.u32 3, %v4634_v45  ;;  %v3815_v4 = vpop.eup %3814  ;;  %3834 = vtanh.f32 %v858_v52  ;;  %vm4713_vm10 = vcmp.eq.s32.totalorder %v1638_v33, %v4650_v42 }
 0x1fb   : > { %v3817_v51 = vpop.eup %3816  ;;  %3836 = vtanh.f32 %v853_v50  ;;  %v1095_v28 = vmul.f32 %v3813_v39, %v4367_v12  ;;  %v1097_v8 = vmul.f32 %v3815_v4, %v4367_v12  ;;  %vm1418_vm12 = vcmp.lt.s32.totalorder %v4665_v24, %v4639_v54 }
 0x1fc   : > { %v3819_v23 = vpop.eup %3818  ;;  %vm4672_vm1 = vcmp.eq.s32.totalorder %v1610_v5, %v4650_v42  ;;  %vm4685_vm5 = vcmp.eq.s32.totalorder %v1624_v6, %v4650_v42  ;;  %v1096_v58 = vmul.f32 %v3817_v51, %v4367_v12  ;;  %v4743_v5 = vld [vmem:[#allocation7] ss:$0 sm:$0xff]  ;;  %v1680_v52 = vand.u32 3, %v4722_v22 }
 0x1fd   : > { %v3821_v13 = vpop.eup %3820  ;;  %v4772_v33 = vadd.s32 96, %v4628_v19 }
 0x1fe   : > { %1238 = vadd.xlane.f32.xlu1 %v1083_v3  ;;  %1240 = vadd.xlane.f32.xlu0 %v1084_v20  ;;  %v1631_v20 = vand.u32 3, %v4642_v48  ;;  %v1094_v3 = vmul.f32 %v3811_v15, %v4367_v12  ;;  %v3823_v34 = vpop.eup %3822  ;;  %v4832_v48 = vadd.s32 112, %v4628_v19 }
 0x1ff   : > { %v3825_v57 = vpop.eup %3824  ;;  %v4746_v39 = vmul.f32 %v4743_v5, %v3823_v34 }
 0x200   : > { %vm4708_vm9 = vcmp.eq.s32.totalorder %v1631_v20, %v4650_v42  ;;  %v3827_v44 = vpop.eup %3826  ;;  %v1708_v49 = vand.u32 3, %v4832_v48 }
 0x201   : > { %v3829_v32 = vpop.eup %3828  ;;  %v4769_v50 = vmul.f32 %v4743_v5, %v3827_v44 }
 0x202   : > { %1242 = vadd.xlane.f32.xlu1 %v1085_v30  ;;  %1244 = vadd.xlane.f32.xlu0 %v1086_v2  ;;  %v4681_v2 = vadd.s32 56, %v4628_v19  ;;  %v4695_v30 = vadd.s32 64, %v4628_v19  ;;  %v3831_v15 = vpop.eup %3830  ;;  %v1102_v55 = vmul.f32 %v4743_v5, %v3829_v32 }
 0x204   : > { %v1666_v27 = vand.u32 3, %v4695_v30  ;;  %vm1419_vm15 = vcmp.lt.s32.totalorder %v4681_v2, %v4639_v54 }
 0x206   : > { %1246 = vadd.xlane.f32.xlu1 %v1087_v17  ;;  %1248 = vadd.xlane.f32.xlu0 %v1088_v43  ;;  %v4704_v43 = vadd.s32 72, %v4628_v19  ;;  %v4717_v17 = vld [vmem:[#allocation6] ss:$0 sm:$0xff] }
 0x207   : > { %v863_v11 = vadd.f32 %v4717_v17, %v4490_v47  ;;  %v868_v31 = vadd.f32 %v4717_v17, %v4488_v40  ;;  %v1098_v47 = vmul.f32 %v3821_v13, %v4367_v12  ;;  %v878_v40 = vadd.f32 %v4717_v17, %v4496_v1 }
 0x208   : > { %v1100_v1 = vmul.f32 %v4743_v5, %v3825_v57  ;;  %v873_v4 = vadd.f32 %v4717_v17, %v4498_v9  ;;  %v883_v57 = vadd.f32 %v4717_v17, %v4506_v36 }
 0x209   : > { %3838 = vtanh.f32 %v863_v11 }
 0x20a   : > { %1250 = vadd.xlane.f32.xlu1 %v1089_v21  ;;  %1252 = vadd.xlane.f32.xlu0 %v1090_v16  ;;  %v1659_v21 = vand.u32 3, %v4681_v2  ;;  %3840 = vtanh.f32 %v868_v31  ;;  %v1694_v31 = vand.u32 3, %v4772_v33  ;;  %v4914_v2 = vadd.s32 128, %v4628_v19 }
 0x20b   : > { %3842 = vtanh.f32 %v878_v40 }
 0x20c   : > { %3844 = vtanh.f32 %v873_v4  ;;  %v898_v4 = vadd.f32 %v4717_v17, %v4512_v53  ;;  %v893_v53 = vadd.f32 %v4717_v17, %v4514_v59 }
 0x20d   : > { %3846 = vtanh.f32 %v883_v57 }
 0x20e   : > { %1254 = vadd.xlane.f32.xlu1 %v1091_v38  ;;  %1256 = vadd.xlane.f32.xlu0 %v1092_v63  ;;  %v4734_v63 = vmul.f32 %v3819_v23, %v4367_v12  ;;  %v1673_v12 = vand.u32 3, %v4704_v43  ;;  %v4750_v38 = vadd.s32 88, %v4628_v19  ;;  %v3833_v23 = vpop.eup %3832 }
 0x210   : > { %v1687_v45 = vand.u32 3, %v4750_v38 }
 0x212   : > { %1258 = vadd.xlane.f32.xlu1 %v1093_v56  ;;  %1260 = vadd.xlane.f32.xlu0 %v1094_v3  ;;  %v4782_v56 = vmul.f32 %v4743_v5, %v3831_v15 }
 0x213   : > { %v1121_v16 = vpop.xlane.xlu0 %1120 }
 0x214   : > { %v1508_v0 = vsel %vm1412_vm0, %v1121_v16, 0.0  ;;  %vm1420_vm0 = vcmp.lt.s32.totalorder %v4695_v30, %v4639_v54 }
 0x215   : > { %v2854_v20 = vsel %vm4672_vm1, %v1508_v0, 0.0  ;;  %vm4796_vm1 = vcmp.eq.s32.totalorder %v1659_v21, %v4650_v42 }
 0x216   : > { %1262 = vadd.xlane.f32.xlu1 %v1095_v28  ;;  %1264 = vadd.xlane.f32.xlu0 %v1096_v58  ;;  %v2951_v60 = vsel %vm2950_vm2, %v2854_v20, 0.0  ;;  %v3835_v58 = vpop.eup %3834  ;;  %v888_v28 = vadd.f32 %v4717_v17, %v4504_v29 }
 0x217   : > { %v1125_v51 = vpop.xlane.xlu1 %1124  ;;  %v1123_v3 = vpop.xlane.xlu0 %1122 }
 0x218   : > { %v1510_v13 = vsel %vm1414_vm3, %v1125_v51, 0.0  ;;  %v1509_v9 = vsel %vm1413_vm4, %v1123_v3, 0.0  ;;  %vm4801_vm3 = vcmp.eq.s32.totalorder %v1666_v27, %v4650_v42  ;;  %v3837_v21 = vpop.eup %3836  ;;  %vm1421_vm4 = vcmp.lt.s32.totalorder %v4704_v43, %v4639_v54 }
 0x219   : > { %v2856_v34 = vsel %vm4685_vm5, %v1510_v13, 0.0  ;;  %v2855_v10 = vsel %vm4690_vm6, %v1509_v9, 0.0  ;;  %vm1422_vm5 = vcmp.lt.s32.totalorder %v4722_v22, %v4639_v54  ;;  %vm4838_vm6 = vcmp.eq.s32.totalorder %v1673_v12, %v4650_v42 }
 0x21a   : > { %v2952_v46 = vsel %vm2950_vm2, %v2855_v10, 0.0  ;;  %1266 = vadd.xlane.f32.xlu1 %v1097_v8  ;;  %1268 = vadd.xlane.f32.xlu0 %v1098_v47  ;;  %v4810_v8 = vmul.f32 %v4743_v5, %v3833_v23  ;;  %v2954_v32 = vsel %vm2950_vm2, %v2856_v34, 0.0  ;;  %v4821_v47 = vadd.s32 104, %v4628_v19 }
 0x21b   : > { %v2953_v11 = vadd.f32 %v2952_v46, %v2951_v60  ;;  %v1127_v44 = vpop.xlane.xlu1 %1126  ;;  %v1129_v16 = vpop.xlane.xlu0 %1128  ;;  %3848 = vtanh.f32 %v888_v28  ;;  %v4853_v12 = vmul.f32 %v4743_v5, %v3835_v58  ;;  %v908_v46 = vadd.f32 %v4717_v17, %v4520_v25 }
 0x21c   : > { %v1511_v0 = vsel %vm1415_vm7, %v1127_v44, 0.0  ;;  %v1512_v36 = vsel %vm1416_vm8, %v1129_v16, 0.0  ;;  %vm4843_vm7 = vcmp.eq.s32.totalorder %v1680_v52, %v4650_v42  ;;  %v1701_v13 = vand.u32 3, %v4821_v47 }
 0x21d   : > { %v2955_v29 = vadd.f32 %v2954_v32, %v2953_v11  ;;  %v2857_v27 = vsel %vm4708_vm9, %v1511_v0, 0.0  ;;  %v2858_v15 = vsel %vm4713_vm10, %v1512_v36, 0.0  ;;  %vm1423_vm8 = vcmp.lt.s32.totalorder %v4750_v38, %v4639_v54 }
 0x21e   : > { %v2956_v37 = vsel %vm2950_vm2, %v2857_v27, 0.0  ;;  %v2958_v40 = vsel %vm2950_vm2, %v2858_v15, 0.0  ;;  %1270 = vadd.xlane.f32.xlu1 %v4734_v63  ;;  %1272 = vadd.xlane.f32.xlu0 %v1100_v1  ;;  %v4850_v63 = vmul.f32 %v4743_v5, %v3837_v21  ;;  %v3839_v1 = vpop.eup %3838  ;;  %vm1424_vm9 = vcmp.lt.s32.totalorder %v4772_v33, %v4639_v54 }
 0x21f   : > { %v2957_v20 = vadd.f32 %v2956_v37, %v2955_v29  ;;  %v1131_v51 = vpop.xlane.xlu1 %1130  ;;  %v1133_v3 = vpop.xlane.xlu0 %1132  ;;  %3850 = vtanh.f32 %v898_v4  ;;  %vm4877_vm10 = vcmp.eq.s32.totalorder %v1687_v45, %v4650_v42  ;;  %v4894_v45 = vadd.s32 120, %v4628_v19 }
 0x220   : > { %v1513_v52 = vsel %vm1417_vm11, %v1131_v51, 0.0  ;;  %v1514_v23 = vsel %vm1418_vm12, %v1133_v3, 0.0  ;;  %v3841_v9 = vpop.eup %3840  ;;  %vm4882_vm11 = vcmp.eq.s32.totalorder %v1694_v31, %v4650_v42  ;;  %3852 = vtanh.f32 %v893_v53 }
 0x221   : > { %v2959_v34 = vadd.f32 %v2958_v40, %v2957_v20  ;;  %v2859_v10 = vsel %vm4753_vm13, %v1513_v52, 0.0  ;;  %v2860_v60 = vsel %vm4759_vm14, %v1514_v23, 0.0  ;;  %v3843_v57 = vpop.eup %3842  ;;  %v4903_v31 = vmul.f32 %v4743_v5, %v3841_v9 }
 0x222   : > { %v2960_v59 = vsel %vm2950_vm2, %v2859_v10, 0.0  ;;  %v2962_v24 = vsel %vm2950_vm2, %v2860_v60, 0.0  ;;  %1274 = vadd.xlane.f32.xlu1 %v4746_v39  ;;  %1276 = vadd.xlane.f32.xlu0 %v1102_v55  ;;  %v903_v39 = vadd.f32 %v4717_v17, %v4522_v35  ;;  %v4891_v55 = vmul.f32 %v4743_v5, %v3839_v1  ;;  %v3845_v16 = vpop.eup %3844 }
 0x223   : > { %v2961_v58 = vadd.f32 %v2960_v59, %v2959_v34  ;;  %v1135_v11 = vpop.xlane.xlu1 %1134  ;;  %v1137_v44 = vpop.xlane.xlu0 %1136  ;;  %vm1425_vm12 = vcmp.lt.s32.totalorder %v4821_v47, %v4639_v54  ;;  %vm1426_vm13 = vcmp.lt.s32.totalorder %v4832_v48, %v4639_v54  ;;  %3854 = vtanh.f32 %v908_v46 }
 0x224   : > { %v1515_v28 = vsel %vm1419_vm15, %v1135_v11, 0.0  ;;  %v1516_v25 = vsel %vm1420_vm0, %v1137_v44, 0.0  ;;  %vm4921_vm14 = vcmp.eq.s32.totalorder %v1701_v13, %v4650_v42  ;;  %vm4926_vm15 = vcmp.eq.s32.totalorder %v1708_v49, %v4650_v42  ;;  %v3847_v37 = vpop.eup %3846 }
 0x225   : > { %v2963_v35 = vadd.f32 %v2962_v24, %v2961_v58  ;;  %v2861_v21 = vsel %vm4796_vm1, %v1515_v28, 0.0  ;;  %v2862_v32 = vsel %vm4801_vm3, %v1516_v25, 0.0  ;;  %v918_v36 = vadd.f32 %v4717_v17, %v4530_v62  ;;  %v3849_v51 = vpop.eup %3848 }
 0x226   : > { %v2964_v30 = vsel %vm2950_vm2, %v2861_v21, 0.0  ;;  %v2966_v0 = vsel %vm2950_vm2, %v2862_v32, 0.0  ;;  %1278 = vadd.xlane.f32.xlu1 %v4769_v50  ;;  %1280 = vadd.xlane.f32.xlu0 %v4810_v8  ;;  %3856 = vtanh.f32 %v903_v39  ;;  %v1715_v50 = vand.u32 3, %v4894_v45 }
 0x227   : > { %v2965_v29 = vadd.f32 %v2964_v30, %v2963_v35  ;;  %v1139_v27 = vpop.xlane.xlu1 %1138  ;;  %v1141_v15 = vpop.xlane.xlu0 %1140  ;;  %v1110_v8 = vmul.f32 %v4743_v5, %v3845_v16  ;;  %v913_v62 = vadd.f32 %v4717_v17, %v4532_v7  ;;  %v4943_v20 = vadd.s32 136, %v4628_v19 }
 0x228   : > { %v1517_v40 = vsel %vm1421_vm4, %v1139_v27, 0.0  ;;  %v1518_v4 = vsel %vm1422_vm5, %v1141_v15, 0.0  ;;  %vm1427_vm0 = vcmp.lt.s32.totalorder %v4894_v45, %v4639_v54  ;;  %vm1428_vm1 = vcmp.lt.s32.totalorder %v4914_v2, %v4639_v54 }
 0x229   : > { %v2967_v3 = vadd.f32 %v2966_v0, %v2965_v29  ;;  %v2863_v1 = vsel %vm4838_vm6, %v1517_v40, 0.0  ;;  %v2864_v52 = vsel %vm4843_vm7, %v1518_v4, 0.0  ;;  %v1722_v43 = vand.u32 3, %v4914_v2 }
 0x22a   : > { %v2968_v7 = vsel %vm2950_vm2, %v2863_v1, 0.0  ;;  %v2970_v17 = vsel %vm2950_vm2, %v2864_v52, 0.0  ;;  %1282 = vadd.xlane.f32.xlu1 %v4782_v56  ;;  %1284 = vadd.xlane.f32.xlu0 %v4850_v63  ;;  %3858 = vtanh.f32 %v918_v36  ;;  %v4959_v22 = vmul.f32 %v4743_v5, %v3843_v57  ;;  %v3851_v56 = vpop.eup %3850 }
 0x22b   : > { %v2969_v14 = vadd.f32 %v2968_v7, %v2967_v3  ;;  %v1143_v61 = vpop.xlane.xlu1 %1142  ;;  %v1145_v23 = vpop.xlane.xlu0 %1144  ;;  %vm4962_vm3 = vcmp.eq.s32.totalorder %v1715_v50, %v4650_v42  ;;  %v1112_v13 = vmul.f32 %v4743_v5, %v3847_v37  ;;  %v4968_v9 = vadd.s32 144, %v4628_v19 }
 0x22c   : > { %v1519_v63 = vsel %vm1423_vm8, %v1143_v61, 0.0  ;;  %v1520_v34 = vsel %vm1424_vm9, %v1145_v23, 0.0  ;;  %3860 = vtanh.f32 %v913_v62  ;;  %v1729_v10 = vand.u32 3, %v4943_v20  ;;  %v3853_v38 = vpop.eup %3852 }
 0x22d   : > { %v2971_v60 = vadd.f32 %v2970_v17, %v2969_v14  ;;  %v2865_v49 = vsel %vm4877_vm10, %v1519_v63, 0.0  ;;  %v2866_v59 = vsel %vm4882_vm11, %v1520_v34, 0.0  ;;  %vm4982_vm4 = vcmp.eq.s32.totalorder %v1722_v43, %v4650_v42  ;;  %v3855_v39 = vpop.eup %3854 }
 0x22e   : > { %v2972_v46 = vsel %vm2950_vm2, %v2865_v49, 0.0  ;;  %v2974_v33 = vsel %vm2950_vm2, %v2866_v59, 0.0  ;;  %1286 = vadd.xlane.f32.xlu1 %v4853_v12  ;;  %1288 = vadd.xlane.f32.xlu0 %v4891_v55  ;;  %vm1429_vm5 = vcmp.lt.s32.totalorder %v4943_v20, %v4639_v54  ;;  %v1113_v6 = vmul.f32 %v4743_v5, %v3849_v51 }
 0x22f   : > { %v2973_v41 = vadd.f32 %v2972_v46, %v2971_v60  ;;  %v1147_v57 = vpop.xlane.xlu1 %1146  ;;  %v1149_v58 = vpop.xlane.xlu0 %1148  ;;  %vm1430_vm6 = vcmp.lt.s32.totalorder %v4968_v9, %v4639_v54  ;;  %v1736_v11 = vand.u32 3, %v4968_v9  ;;  %v4997_v44 = vadd.s32 152, %v4628_v19 }
 0x230   : > { %v1521_v12 = vsel %vm1425_vm12, %v1147_v57, 0.0  ;;  %v1522_v55 = vsel %vm1426_vm13, %v1149_v58, 0.0  ;;  %vm5006_vm7 = vcmp.eq.s32.totalorder %v1729_v10, %v4650_v42  ;;  %v1335_v28 = vadd.s32 160, %v4628_v19  ;;  %v3857_v25 = vpop.eup %3856 }
 0x231   : > { %v2975_v35 = vadd.f32 %v2974_v33, %v2973_v41  ;;  %v2867_v21 = vsel %vm4921_vm14, %v1521_v12, 0.0  ;;  %v2868_v47 = vsel %vm4926_vm15, %v1522_v55, 0.0  ;;  %v1114_v32 = vmul.f32 %v4743_v5, %v3853_v38 }
 0x232   : > { %v2976_v48 = vsel %vm2950_vm2, %v2867_v21, 0.0  ;;  %v2978_v30 = vsel %vm2950_vm2, %v2868_v47, 0.0  ;;  %1290 = vadd.xlane.f32.xlu1 %v4903_v31  ;;  %1292 = vadd.xlane.f32.xlu0 %v1110_v8  ;;  %v1115_v0 = vmul.f32 %v4743_v5, %v3851_v56  ;;  %v5021_v36 = vadd.s32 168, %v4628_v19 }
 0x233   : > { %v2977_v29 = vadd.f32 %v2976_v48, %v2975_v35  ;;  %v1151_v26 = vpop.xlane.xlu1 %1150  ;;  %v1153_v27 = vpop.xlane.xlu0 %1152  ;;  %vm5024_vm8 = vcmp.eq.s32.totalorder %v1736_v11, %v4650_v42  ;;  %vm1431_vm9 = vcmp.lt.s32.totalorder %v4997_v44, %v4639_v54  ;;  %v1743_v15 = vand.u32 3, %v4997_v44 }
 0x234   : > { %v3859_v31 = vpop.eup %3858  ;;  %v1523_v50 = vsel %vm1427_vm0, %v1151_v26, 0.0  ;;  %v1524_v8 = vsel %vm1428_vm1, %v1153_v27, 0.0  ;;  %v1750_v37 = vand.u32 3, %v1335_v28  ;;  %v1337_v40 = vadd.s32 176, %v4628_v19 }
 0x235   : > { %v2979_v4 = vadd.f32 %v2978_v30, %v2977_v29  ;;  %v2869_v62 = vsel %vm4962_vm3, %v1523_v50, 0.0  ;;  %v2870_v51 = vsel %vm4982_vm4, %v1524_v8, 0.0  ;;  %vm1432_vm10 = vcmp.lt.s32.totalorder %v1335_v28, %v4639_v54 }
 0x236   : > { %v3861_v3 = vpop.eup %3860  ;;  %v2980_v45 = vsel %vm2950_vm2, %v2869_v62, 0.0  ;;  %v2982_v1 = vsel %vm2950_vm2, %v2870_v51, 0.0  ;;  %1294 = vadd.xlane.f32.xlu1 %v4959_v22  ;;  %1296 = vadd.xlane.f32.xlu0 %v1112_v13  ;;  %vm1433_vm11 = vcmp.lt.s32.totalorder %v5021_v36, %v4639_v54  ;;  %v1757_v2 = vand.u32 3, %v5021_v36 }
 0x237   : > { %v2981_v52 = vadd.f32 %v2980_v45, %v2979_v4  ;;  %v1155_v43 = vpop.xlane.xlu1 %1154  ;;  %v1157_v7 = vpop.xlane.xlu0 %1156  ;;  %vm5050_vm12 = vcmp.eq.s32.totalorder %v1743_v15, %v4650_v42  ;;  %v1117_v14 = vmul.f32 %v4743_v5, %v3855_v39  ;;  %v1338_v61 = vadd.s32 184, %v4628_v19 }
 0x238   : > { %v1525_v22 = vsel %vm1429_vm5, %v1155_v43, 0.0  ;;  %v1526_v23 = vsel %vm1430_vm6, %v1157_v7, 0.0  ;;  %vm5063_vm13 = vcmp.eq.s32.totalorder %v1750_v37, %v4650_v42  ;;  %v1764_v13 = vand.u32 3, %v1337_v40 }
 0x239   : > { %v2983_v56 = vadd.f32 %v2982_v1, %v2981_v52  ;;  %v2871_v63 = vsel %vm5006_vm7, %v1525_v22, 0.0  ;;  %v2872_v34 = vsel %vm5024_vm8, %v1526_v23, 0.0  ;;  %v1339_v20 = vadd.s32 192, %v4628_v19 }
 0x23a   : > { %v2984_v10 = vsel %vm2950_vm2, %v2871_v63, 0.0  ;;  %v2986_v9 = vsel %vm2950_vm2, %v2872_v34, 0.0  ;;  %1298 = vadd.xlane.f32.xlu1 %v1113_v6  ;;  %1300 = vadd.xlane.f32.xlu0 %v1114_v32  ;;  %vm5075_vm14 = vcmp.eq.s32.totalorder %v1757_v2, %v4650_v42  ;;  %v1116_v49 = vmul.f32 %v4743_v5, %v3857_v25 }
 0x23b   : > { %v2985_v59 = vadd.f32 %v2984_v10, %v2983_v56  ;;  %v1159_v24 = vpop.xlane.xlu1 %1158  ;;  %v1161_v38 = vpop.xlane.xlu0 %1160  ;;  %vm1434_vm15 = vcmp.lt.s32.totalorder %v1337_v40, %v4639_v54  ;;  %vm1435_vm0 = vcmp.lt.s32.totalorder %v1338_v61, %v4639_v54  ;;  %v1771_v46 = vand.u32 3, %v1338_v61 }
 0x23c   : > { %v1527_v33 = vsel %vm1431_vm9, %v1159_v24, 0.0  ;;  %v1528_v6 = vsel %vm1432_vm10, %v1161_v38, 0.0  ;;  %vm5088_vm1 = vcmp.eq.s32.totalorder %v1764_v13, %v4650_v42  ;;  %v1340_v57 = vadd.s32 200, %v4628_v19 }
 0x23d   : > { %v2987_v58 = vadd.f32 %v2986_v9, %v2985_v59  ;;  %v2873_v11 = vsel %vm5050_vm12, %v1527_v33, 0.0  ;;  %v2874_v39 = vsel %vm5063_vm13, %v1528_v6, 0.0  ;;  %v1778_v12 = vand.u32 3, %v1339_v20 }
 0x23e   : > { %v2988_v44 = vsel %vm2950_vm2, %v2873_v11, 0.0  ;;  %v2990_v55 = vsel %vm2950_vm2, %v2874_v39, 0.0  ;;  %1302 = vadd.xlane.f32.xlu1 %v1115_v0  ;;  %1304 = vadd.xlane.f32.xlu0 %v1116_v49  ;;  %v1118_v16 = vmul.f32 %v4743_v5, %v3861_v3  ;;  %v1341_v28 = vadd.s32 208, %v4628_v19 }
 0x23f   : > { %v2989_v25 = vadd.f32 %v2988_v44, %v2987_v58  ;;  %v1163_v35 = vpop.xlane.xlu1 %1162  ;;  %v1165_v21 = vpop.xlane.xlu0 %1164  ;;  %vm1436_vm3 = vcmp.lt.s32.totalorder %v1339_v20, %v4639_v54  ;;  %v1119_v47 = vmul.f32 %v4743_v5, %v3859_v31  ;;  %v1342_v32 = vadd.s32 216, %v4628_v19 }
 0x240   : > { %v1529_v48 = vsel %vm1433_vm11, %v1163_v35, 0.0  ;;  %v1530_v30 = vsel %vm1434_vm15, %v1165_v21, 0.0  ;;  %vm5110_vm4 = vcmp.eq.s32.totalorder %v1771_v46, %v4650_v42  ;;  %v1785_v29 = vand.u32 3, %v1340_v57 }
 0x241   : > { %v2991_v26 = vadd.f32 %v2990_v55, %v2989_v25  ;;  %v2875_v27 = vsel %vm5075_vm14, %v1529_v48, 0.0  ;;  %v2876_v5 = vsel %vm5088_vm1, %v1530_v30, 0.0  ;;  %vm5122_vm5 = vcmp.eq.s32.totalorder %v1778_v12, %v4650_v42 }
 0x242   : > { %v2992_v36 = vsel %vm2950_vm2, %v2875_v27, 0.0  ;;  %v2994_v15 = vsel %vm2950_vm2, %v2876_v5, 0.0  ;;  %1306 = vadd.xlane.f32.xlu1 %v1117_v14  ;;  %1308 = vadd.xlane.f32.xlu0 %v1118_v16  ;;  %v1792_v50 = vand.u32 3, %v1341_v28  ;;  %vm1437_vm6 = vcmp.lt.s32.totalorder %v1340_v57, %v4639_v54 }
 0x243   : > { %v2993_v8 = vadd.f32 %v2992_v36, %v2991_v26  ;;  %v1167_v37 = vpop.xlane.xlu1 %1166  ;;  %v1169_v40 = vpop.xlane.xlu0 %1168  ;;  %vm1438_vm7 = vcmp.lt.s32.totalorder %v1341_v28, %v4639_v54  ;;  %v1799_v4 = vand.u32 3, %v1342_v32  ;;  %vm5133_vm8 = vcmp.eq.s32.totalorder %v1785_v29, %v4650_v42 }
 0x244   : > { %v1531_v62 = vsel %vm1435_vm0, %v1167_v37, 0.0  ;;  %v1532_v51 = vsel %vm1436_vm3, %v1169_v40, 0.0  ;;  %v1344_v45 = vadd.s32 232, %v4628_v19  ;;  %v1806_v43 = vand.u32 3, %v1343_v18 }
 0x245   : > { %v2995_v1 = vadd.f32 %v2994_v15, %v2993_v8  ;;  %v2877_v2 = vsel %vm5110_vm4, %v1531_v62, 0.0  ;;  %v2878_v52 = vsel %vm5122_vm5, %v1532_v51, 0.0  ;;  %vm5145_vm9 = vcmp.eq.s32.totalorder %v1792_v50, %v4650_v42 }
 0x246   : > { %v2996_v7 = vsel %vm2950_vm2, %v2877_v2, 0.0  ;;  %v2998_v17 = vsel %vm2950_vm2, %v2878_v52, 0.0  ;;  %1310 = vadd.xlane.f32.xlu1 %v1119_v47  ;;  %v1345_v61 = vadd.s32 240, %v4628_v19  ;;  %vm1439_vm10 = vcmp.lt.s32.totalorder %v1342_v32, %v4639_v54 }
 0x247   : > { %v2997_v22 = vadd.f32 %v2996_v7, %v2995_v1  ;;  %v1171_v23 = vpop.xlane.xlu1 %1170  ;;  %v1173_v53 = vpop.xlane.xlu0 %1172  ;;  %vm1440_vm11 = vcmp.lt.s32.totalorder %v1343_v18, %v4639_v54  ;;  %v1346_v13 = vadd.s32 248, %v4628_v19  ;;  %vm5158_vm12 = vcmp.eq.s32.totalorder %v1799_v4, %v4650_v42 }
 0x248   : > { %v1533_v56 = vsel %vm1437_vm6, %v1171_v23, 0.0  ;;  %v1534_v63 = vsel %vm1438_vm7, %v1173_v53, 0.0  ;;  %v1813_v20 = vand.u32 3, %v1344_v45  ;;  %v1347_v49 = vadd.s32 256, %v4628_v19 }
 0x249   : > { %v2999_v10 = vadd.f32 %v2998_v17, %v2997_v22  ;;  %v2879_v9 = vsel %vm5133_vm8, %v1533_v56, 0.0  ;;  %v2880_v60 = vsel %vm5145_vm9, %v1534_v63, 0.0  ;;  %vm5170_vm13 = vcmp.eq.s32.totalorder %v1806_v43, %v4650_v42 }
 0x24a   : > { %v3000_v59 = vsel %vm2950_vm2, %v2879_v9, 0.0  ;;  %v3002_v24 = vsel %vm2950_vm2, %v2880_v60, 0.0  ;;  %v1820_v46 = vand.u32 3, %v1345_v61  ;;  %vm1441_vm14 = vcmp.lt.s32.totalorder %v1344_v45, %v4639_v54 }
 0x24b   : > { %v3001_v33 = vadd.f32 %v3000_v59, %v2999_v10  ;;  %v1175_v6 = vpop.xlane.xlu1 %1174  ;;  %v1177_v41 = vpop.xlane.xlu0 %1176  ;;  %vm1442_vm15 = vcmp.lt.s32.totalorder %v1345_v61, %v4639_v54  ;;  %v1827_v57 = vand.u32 3, %v1346_v13  ;;  %vm5181_vm0 = vcmp.eq.s32.totalorder %v1813_v20, %v4650_v42 }
 0x24c   : > { %v1535_v58 = vsel %vm1439_vm10, %v1175_v6, 0.0  ;;  %v1536_v11 = vsel %vm1440_vm11, %v1177_v41, 0.0  ;;  %v1348_v12 = vadd.s32 264, %v4628_v19  ;;  %v1834_v28 = vand.u32 3, %v1347_v49 }
 0x24d   : > { %v3003_v44 = vadd.f32 %v3002_v24, %v3001_v33  ;;  %v2881_v55 = vsel %vm5158_vm12, %v1535_v58, 0.0  ;;  %v2882_v16 = vsel %vm5170_vm13, %v1536_v11, 0.0  ;;  %vm5193_vm1 = vcmp.eq.s32.totalorder %v1820_v46, %v4650_v42 }
 0x24e   : > { %v3004_v25 = vsel %vm2950_vm2, %v2881_v55, 0.0  ;;  %v3006_v35 = vsel %vm2950_vm2, %v2882_v16, 0.0  ;;  %v1349_v47 = vadd.s32 272, %v4628_v19  ;;  %vm1443_vm3 = vcmp.lt.s32.totalorder %v1346_v13, %v4639_v54 }
 0x24f   : > { %v3005_v32 = vadd.f32 %v3004_v25, %v3003_v44  ;;  %v1179_v48 = vpop.xlane.xlu1 %1178  ;;  %v1181_v30 = vpop.xlane.xlu0 %1180  ;;  %vm1444_vm4 = vcmp.lt.s32.totalorder %v1347_v49, %v4639_v54  ;;  %v1350_v0 = vadd.s32 280, %v4628_v19  ;;  %vm5206_vm5 = vcmp.eq.s32.totalorder %v1827_v57, %v4650_v42 }
 0x250   : > { %v1537_v29 = vsel %vm1441_vm14, %v1179_v48, 0.0  ;;  %v1538_v26 = vsel %vm1442_vm15, %v1181_v30, 0.0  ;;  %v1841_v5 = vand.u32 3, %v1348_v12  ;;  %v1351_v31 = vadd.s32 288, %v4628_v19 }
 0x251   : > { %v3007_v18 = vadd.f32 %v3006_v35, %v3005_v32  ;;  %v2883_v36 = vsel %vm5181_vm0, %v1537_v29, 0.0  ;;  %v2884_v15 = vsel %vm5193_vm1, %v1538_v26, 0.0  ;;  %vm5218_vm6 = vcmp.eq.s32.totalorder %v1834_v28, %v4650_v42 }
 0x252   : > { %v3008_v50 = vsel %vm2950_vm2, %v2883_v36, 0.0  ;;  %v3010_v8 = vsel %vm2950_vm2, %v2884_v15, 0.0  ;;  %v1848_v40 = vand.u32 3, %v1349_v47  ;;  %vm1445_vm7 = vcmp.lt.s32.totalorder %v1348_v12, %v4639_v54 }
 0x253   : > { %v3009_v4 = vadd.f32 %v3008_v50, %v3007_v18  ;;  %v1183_v62 = vpop.xlane.xlu1 %1182  ;;  %v1185_v51 = vpop.xlane.xlu0 %1184  ;;  %vm1446_vm8 = vcmp.lt.s32.totalorder %v1349_v47, %v4639_v54  ;;  %v1855_v3 = vand.u32 3, %v1350_v0  ;;  %vm5229_vm9 = vcmp.eq.s32.totalorder %v1841_v5, %v4650_v42 }
 0x254   : > { %v1539_v45 = vsel %vm1443_vm3, %v1183_v62, 0.0  ;;  %v1540_v1 = vsel %vm1444_vm4, %v1185_v51, 0.0  ;;  %v1352_v52 = vadd.s32 296, %v4628_v19  ;;  %v1862_v14 = vand.u32 3, %v1351_v31 }
 0x255   : > { %v3011_v43 = vadd.f32 %v3010_v8, %v3009_v4  ;;  %v2885_v7 = vsel %vm5206_vm5, %v1539_v45, 0.0  ;;  %v2886_v17 = vsel %vm5218_vm6, %v1540_v1, 0.0  ;;  %vm5241_vm10 = vcmp.eq.s32.totalorder %v1848_v40, %v4650_v42 }
 0x256   : > { %v3012_v61 = vsel %vm2950_vm2, %v2885_v7, 0.0  ;;  %v3014_v22 = vsel %vm2950_vm2, %v2886_v17, 0.0  ;;  %v1353_v53 = vadd.s32 304, %v4628_v19  ;;  %vm1447_vm11 = vcmp.lt.s32.totalorder %v1350_v0, %v4639_v54 }
 0x257   : > { %v3013_v13 = vadd.f32 %v3012_v61, %v3011_v43  ;;  %v1187_v56 = vpop.xlane.xlu1 %1186  ;;  %v1189_v63 = vpop.xlane.xlu0 %1188  ;;  %vm1448_vm12 = vcmp.lt.s32.totalorder %v1351_v31, %v4639_v54  ;;  %v1354_v34 = vadd.s32 312, %v4628_v19  ;;  %vm5254_vm13 = vcmp.eq.s32.totalorder %v1855_v3, %v4650_v42 }
 0x258   : > { %v1541_v20 = vsel %vm1445_vm7, %v1187_v56, 0.0  ;;  %v1542_v10 = vsel %vm1446_vm8, %v1189_v63, 0.0  ;;  %v1869_v60 = vand.u32 3, %v1352_v52  ;;  %v1355_v38 = vadd.s32 320, %v4628_v19 }
 0x259   : > { %v3015_v49 = vadd.f32 %v3014_v22, %v3013_v13  ;;  %v2887_v59 = vsel %vm5229_vm9, %v1541_v20, 0.0  ;;  %v2888_v24 = vsel %vm5241_vm10, %v1542_v10, 0.0  ;;  %vm5266_vm14 = vcmp.eq.s32.totalorder %v1862_v14, %v4650_v42 }
 0x25a   : > { %v3016_v46 = vsel %vm2950_vm2, %v2887_v59, 0.0  ;;  %v3018_v33 = vsel %vm2950_vm2, %v2888_v24, 0.0  ;;  %v1876_v41 = vand.u32 3, %v1353_v53  ;;  %vm1449_vm15 = vcmp.lt.s32.totalorder %v1352_v52, %v4639_v54 }
 0x25b   : > { %v3017_v57 = vadd.f32 %v3016_v46, %v3015_v49  ;;  %v1191_v58 = vpop.xlane.xlu1 %1190  ;;  %v1193_v11 = vpop.xlane.xlu0 %1192  ;;  %vm1450_vm0 = vcmp.lt.s32.totalorder %v1353_v53, %v4639_v54  ;;  %v1883_v39 = vand.u32 3, %v1354_v34  ;;  %vm5277_vm1 = vcmp.eq.s32.totalorder %v1869_v60, %v4650_v42 }
 0x25c   : > { %v1543_v12 = vsel %vm1447_vm11, %v1191_v58, 0.0  ;;  %v1544_v44 = vsel %vm1448_vm12, %v1193_v11, 0.0  ;;  %v1356_v16 = vadd.s32 328, %v4628_v19  ;;  %v1890_v21 = vand.u32 3, %v1355_v38 }
 0x25d   : > { %v3019_v28 = vadd.f32 %v3018_v33, %v3017_v57  ;;  %v2889_v25 = vsel %vm5254_vm13, %v1543_v12, 0.0  ;;  %v2890_v35 = vsel %vm5266_vm14, %v1544_v44, 0.0  ;;  %vm5289_vm3 = vcmp.eq.s32.totalorder %v1876_v41, %v4650_v42 }
 0x25e   : > { %v3020_v47 = vsel %vm2950_vm2, %v2889_v25, 0.0  ;;  %v3022_v32 = vsel %vm2950_vm2, %v2890_v35, 0.0  ;;  %v1357_v30 = vadd.s32 336, %v4628_v19  ;;  %vm1451_vm4 = vcmp.lt.s32.totalorder %v1354_v34, %v4639_v54 }
 0x25f   : > { %v3021_v0 = vadd.f32 %v3020_v47, %v3019_v28  ;;  %v1195_v29 = vpop.xlane.xlu1 %1194  ;;  %v1197_v26 = vpop.xlane.xlu0 %1196  ;;  %vm1452_vm5 = vcmp.lt.s32.totalorder %v1355_v38, %v4639_v54  ;;  %v1358_v27 = vadd.s32 344, %v4628_v19  ;;  %vm5302_vm6 = vcmp.eq.s32.totalorder %v1883_v39, %v4650_v42 }
 0x260   : > { %v1545_v5 = vsel %vm1449_vm15, %v1195_v29, 0.0  ;;  %v1546_v18 = vsel %vm1450_vm0, %v1197_v26, 0.0  ;;  %v1897_v15 = vand.u32 3, %v1356_v16  ;;  %v1359_v37 = vadd.s32 352, %v4628_v19 }
 0x261   : > { %v3023_v31 = vadd.f32 %v3022_v32, %v3021_v0  ;;  %v2891_v50 = vsel %vm5277_vm1, %v1545_v5, 0.0  ;;  %v2892_v8 = vsel %vm5289_vm3, %v1546_v18, 0.0  ;;  %vm5314_vm7 = vcmp.eq.s32.totalorder %v1890_v21, %v4650_v42 }
 0x262   : > { %v3024_v40 = vsel %vm2950_vm2, %v2891_v50, 0.0  ;;  %v3026_v4 = vsel %vm2950_vm2, %v2892_v8, 0.0  ;;  %v1904_v51 = vand.u32 3, %v1357_v30  ;;  %vm1453_vm8 = vcmp.lt.s32.totalorder %v1356_v16, %v4639_v54 }
 0x263   : > { %v3025_v3 = vadd.f32 %v3024_v40, %v3023_v31  ;;  %v1199_v45 = vpop.xlane.xlu1 %1198  ;;  %v1201_v1 = vpop.xlane.xlu0 %1200  ;;  %vm1454_vm9 = vcmp.lt.s32.totalorder %v1357_v30, %v4639_v54  ;;  %v1911_v2 = vand.u32 3, %v1358_v27  ;;  %vm5325_vm10 = vcmp.eq.s32.totalorder %v1897_v15, %v4650_v42 }
 0x264   : > { %v1547_v52 = vsel %vm1451_vm4, %v1199_v45, 0.0  ;;  %v1548_v43 = vsel %vm1452_vm5, %v1201_v1, 0.0  ;;  %v1360_v17 = vadd.s32 360, %v4628_v19  ;;  %v1918_v23 = vand.u32 3, %v1359_v37 }
 0x265   : > { %v3027_v14 = vadd.f32 %v3026_v4, %v3025_v3  ;;  %v2893_v61 = vsel %vm5302_vm6, %v1547_v52, 0.0  ;;  %v2894_v22 = vsel %vm5314_vm7, %v1548_v43, 0.0  ;;  %vm5337_vm11 = vcmp.eq.s32.totalorder %v1904_v51, %v4650_v42 }
 0x266   : > { %v3028_v53 = vsel %vm2950_vm2, %v2893_v61, 0.0  ;;  %v3030_v13 = vsel %vm2950_vm2, %v2894_v22, 0.0  ;;  %v1361_v63 = vadd.s32 368, %v4628_v19  ;;  %vm1455_vm12 = vcmp.lt.s32.totalorder %v1358_v27, %v4639_v54 }
 0x267   : > { %v3029_v34 = vadd.f32 %v3028_v53, %v3027_v14  ;;  %v1203_v20 = vpop.xlane.xlu1 %1202  ;;  %v1205_v10 = vpop.xlane.xlu0 %1204  ;;  %vm1456_vm13 = vcmp.lt.s32.totalorder %v1359_v37, %v4639_v54  ;;  %v1362_v9 = vadd.s32 376, %v4628_v19  ;;  %vm5350_vm14 = vcmp.eq.s32.totalorder %v1911_v2, %v4650_v42 }
 0x268   : > { %v1549_v60 = vsel %vm1453_vm8, %v1203_v20, 0.0  ;;  %v1550_v49 = vsel %vm1454_vm9, %v1205_v10, 0.0  ;;  %v1925_v24 = vand.u32 3, %v1360_v17  ;;  %v1363_v6 = vadd.s32 384, %v4628_v19 }
 0x269   : > { %v3031_v38 = vadd.f32 %v3030_v13, %v3029_v34  ;;  %v2895_v46 = vsel %vm5325_vm10, %v1549_v60, 0.0  ;;  %v2896_v33 = vsel %vm5337_vm11, %v1550_v49, 0.0  ;;  %vm5362_vm15 = vcmp.eq.s32.totalorder %v1918_v23, %v4650_v42 }
 0x26a   : > { %v3032_v41 = vsel %vm2950_vm2, %v2895_v46, 0.0  ;;  %v3034_v57 = vsel %vm2950_vm2, %v2896_v33, 0.0  ;;  %v1932_v11 = vand.u32 3, %v1361_v63  ;;  %vm1457_vm0 = vcmp.lt.s32.totalorder %v1360_v17, %v4639_v54 }
 0x26b   : > { %v3033_v39 = vadd.f32 %v3032_v41, %v3031_v38  ;;  %v1207_v12 = vpop.xlane.xlu1 %1206  ;;  %v1209_v44 = vpop.xlane.xlu0 %1208  ;;  %vm1458_vm1 = vcmp.lt.s32.totalorder %v1361_v63, %v4639_v54  ;;  %v1939_v55 = vand.u32 3, %v1362_v9  ;;  %vm5373_vm3 = vcmp.eq.s32.totalorder %v1925_v24, %v4650_v42 }
 0x26c   : > { %v1551_v16 = vsel %vm1455_vm12, %v1207_v12, 0.0  ;;  %v1552_v28 = vsel %vm1456_vm13, %v1209_v44, 0.0  ;;  %v1364_v35 = vadd.s32 392, %v4628_v19  ;;  %v1946_v48 = vand.u32 3, %v1363_v6 }
 0x26d   : > { %v3035_v21 = vadd.f32 %v3034_v57, %v3033_v39  ;;  %v2897_v47 = vsel %vm5350_vm14, %v1551_v16, 0.0  ;;  %v2898_v32 = vsel %vm5362_vm15, %v1552_v28, 0.0  ;;  %vm5385_vm4 = vcmp.eq.s32.totalorder %v1932_v11, %v4650_v42 }
 0x26e   : > { %v3036_v30 = vsel %vm2950_vm2, %v2897_v47, 0.0  ;;  %v3038_v0 = vsel %vm2950_vm2, %v2898_v32, 0.0  ;;  %v1365_v26 = vadd.s32 400, %v4628_v19  ;;  %vm1459_vm5 = vcmp.lt.s32.totalorder %v1362_v9, %v4639_v54 }
 0x26f   : > { %v3037_v27 = vadd.f32 %v3036_v30, %v3035_v21  ;;  %v1211_v5 = vpop.xlane.xlu1 %1210  ;;  %v1213_v18 = vpop.xlane.xlu0 %1212  ;;  %vm1460_vm6 = vcmp.lt.s32.totalorder %v1363_v6, %v4639_v54  ;;  %v1366_v36 = vadd.s32 408, %v4628_v19  ;;  %vm5398_vm7 = vcmp.eq.s32.totalorder %v1939_v55, %v4650_v42 }
 0x270   : > { %v1553_v15 = vsel %vm1457_vm0, %v1211_v5, 0.0  ;;  %v1554_v31 = vsel %vm1458_vm1, %v1213_v18, 0.0  ;;  %v1953_v8 = vand.u32 3, %v1364_v35  ;;  %v1367_v62 = vadd.s32 416, %v4628_v19 }
 0x271   : > { %v3039_v37 = vadd.f32 %v3038_v0, %v3037_v27  ;;  %v2899_v40 = vsel %vm5373_vm3, %v1553_v15, 0.0  ;;  %v2900_v4 = vsel %vm5385_vm4, %v1554_v31, 0.0  ;;  %vm5410_vm8 = vcmp.eq.s32.totalorder %v1946_v48, %v4650_v42 }
 0x272   : > { %v3040_v51 = vsel %vm2950_vm2, %v2899_v40, 0.0  ;;  %v3042_v3 = vsel %vm2950_vm2, %v2900_v4, 0.0  ;;  %v1960_v1 = vand.u32 3, %v1365_v26  ;;  %vm1461_vm9 = vcmp.lt.s32.totalorder %v1364_v35, %v4639_v54 }
 0x273   : > { %v3041_v2 = vadd.f32 %v3040_v51, %v3039_v37  ;;  %v1215_v52 = vpop.xlane.xlu1 %1214  ;;  %v1217_v43 = vpop.xlane.xlu0 %1216  ;;  %vm1462_vm10 = vcmp.lt.s32.totalorder %v1365_v26, %v4639_v54  ;;  %v1967_v7 = vand.u32 3, %v1366_v36  ;;  %vm5421_vm11 = vcmp.eq.s32.totalorder %v1953_v8, %v4650_v42 }
 0x274   : > { %v1555_v17 = vsel %vm1459_vm5, %v1215_v52, 0.0  ;;  %v1556_v14 = vsel %vm1460_vm6, %v1217_v43, 0.0  ;;  %v1368_v22 = vadd.s32 424, %v4628_v19  ;;  %v1974_v56 = vand.u32 3, %v1367_v62 }
 0x275   : > { %v3043_v23 = vadd.f32 %v3042_v3, %v3041_v2  ;;  %v2901_v53 = vsel %vm5398_vm7, %v1555_v17, 0.0  ;;  %v2902_v13 = vsel %vm5410_vm8, %v1556_v14, 0.0  ;;  %vm5433_vm12 = vcmp.eq.s32.totalorder %v1960_v1, %v4650_v42 }
 0x276   : > { %v3044_v63 = vsel %vm2950_vm2, %v2901_v53, 0.0  ;;  %v3046_v34 = vsel %vm2950_vm2, %v2902_v13, 0.0  ;;  %v1369_v10 = vadd.s32 432, %v4628_v19  ;;  %vm1463_vm13 = vcmp.lt.s32.totalorder %v1366_v36, %v4639_v54 }
 0x277   : > { %v3045_v9 = vadd.f32 %v3044_v63, %v3043_v23  ;;  %v1219_v60 = vpop.xlane.xlu1 %1218  ;;  %v1221_v49 = vpop.xlane.xlu0 %1220  ;;  %vm1464_vm14 = vcmp.lt.s32.totalorder %v1367_v62, %v4639_v54  ;;  %v1370_v59 = vadd.s32 440, %v4628_v19  ;;  %vm5446_vm15 = vcmp.eq.s32.totalorder %v1967_v7, %v4650_v42 }
 0x278   : > { %v1557_v24 = vsel %vm1461_vm9, %v1219_v60, 0.0  ;;  %v1558_v38 = vsel %vm1462_vm10, %v1221_v49, 0.0  ;;  %v1981_v33 = vand.u32 3, %v1368_v22  ;;  %v1371_v58 = vadd.s32 448, %v4628_v19 }
 0x279   : > { %v3047_v6 = vadd.f32 %v3046_v34, %v3045_v9  ;;  %v2903_v41 = vsel %vm5421_vm11, %v1557_v24, 0.0  ;;  %v2904_v57 = vsel %vm5433_vm12, %v1558_v38, 0.0  ;;  %vm5458_vm0 = vcmp.eq.s32.totalorder %v1974_v56, %v4650_v42 }
 0x27a   : > { %v3048_v11 = vsel %vm2950_vm2, %v2903_v41, 0.0  ;;  %v3050_v39 = vsel %vm2950_vm2, %v2904_v57, 0.0  ;;  %v1988_v44 = vand.u32 3, %v1369_v10  ;;  %vm1465_vm1 = vcmp.lt.s32.totalorder %v1368_v22, %v4639_v54 }
 0x27b   : > { %v3049_v55 = vadd.f32 %v3048_v11, %v3047_v6  ;;  %v1223_v16 = vpop.xlane.xlu1 %1222  ;;  %v1225_v28 = vpop.xlane.xlu0 %1224  ;;  %vm1466_vm3 = vcmp.lt.s32.totalorder %v1369_v10, %v4639_v54  ;;  %v1995_v25 = vand.u32 3, %v1370_v59  ;;  %vm5469_vm4 = vcmp.eq.s32.totalorder %v1981_v33, %v4650_v42 }
 0x27c   : > { %v1559_v35 = vsel %vm1463_vm13, %v1223_v16, 0.0  ;;  %v1560_v21 = vsel %vm1464_vm14, %v1225_v28, 0.0  ;;  %v1372_v32 = vadd.s32 456, %v4628_v19  ;;  %v2002_v29 = vand.u32 3, %v1371_v58 }
 0x27d   : > { %v3051_v48 = vadd.f32 %v3050_v39, %v3049_v55  ;;  %v2905_v30 = vsel %vm5446_vm15, %v1559_v35, 0.0  ;;  %v2906_v0 = vsel %vm5458_vm0, %v1560_v21, 0.0  ;;  %vm5481_vm5 = vcmp.eq.s32.totalorder %v1988_v44, %v4650_v42 }
 0x27e   : > { %v3052_v26 = vsel %vm2950_vm2, %v2905_v30, 0.0  ;;  %v3054_v27 = vsel %vm2950_vm2, %v2906_v0, 0.0  ;;  %v1373_v18 = vadd.s32 464, %v4628_v19  ;;  %vm1467_vm6 = vcmp.lt.s32.totalorder %v1370_v59, %v4639_v54 }
 0x27f   : > { %v3053_v36 = vadd.f32 %v3052_v26, %v3051_v48  ;;  %v1227_v15 = vpop.xlane.xlu1 %1226  ;;  %v1229_v31 = vpop.xlane.xlu0 %1228  ;;  %vm5488_vm7 = vcmp.eq.s32.totalorder %v1995_v25, %v4650_v42  ;;  %v1374_v8 = vadd.s32 472, %v4628_v19  ;;  %vm1468_vm8 = vcmp.lt.s32.totalorder %v1371_v58, %v4639_v54 }
 0x280   : > { %v1561_v37 = vsel %vm1465_vm1, %v1227_v15, 0.0  ;;  %v1562_v40 = vsel %vm1466_vm3, %v1229_v31, 0.0  ;;  %v2009_v4 = vand.u32 3, %v1372_v32  ;;  %vm5503_vm9 = vcmp.eq.s32.totalorder %v2002_v29, %v4650_v42 }
 0x281   : > { %v3055_v62 = vadd.f32 %v3054_v27, %v3053_v36  ;;  %v2907_v51 = vsel %vm5469_vm4, %v1561_v37, 0.0  ;;  %v2908_v3 = vsel %vm5481_vm5, %v1562_v40, 0.0  ;;  %v2016_v52 = vand.u32 3, %v1373_v18 }
 0x282   : > { %v3056_v1 = vsel %vm2950_vm2, %v2907_v51, 0.0  ;;  %v3058_v2 = vsel %vm2950_vm2, %v2908_v3, 0.0  ;;  %v1375_v43 = vadd.s32 480, %v4628_v19  ;;  %vm1469_vm10 = vcmp.lt.s32.totalorder %v1372_v32, %v4639_v54 }
 0x283   : > { %v3057_v7 = vadd.f32 %v3056_v1, %v3055_v62  ;;  %v1231_v17 = vpop.xlane.xlu1 %1230  ;;  %v1233_v14 = vpop.xlane.xlu0 %1232  ;;  %v2023_v61 = vand.u32 3, %v1374_v8  ;;  %v1376_v22 = vadd.s32 488, %v4628_v19  ;;  %vm5517_vm11 = vcmp.eq.s32.totalorder %v2009_v4, %v4650_v42 }
 0x284   : > { %v1563_v23 = vsel %vm1467_vm6, %v1231_v17, 0.0  ;;  %v1564_v53 = vsel %vm1468_vm8, %v1233_v14, 0.0  ;;  %vm1470_vm12 = vcmp.lt.s32.totalorder %v1373_v18, %v4639_v54  ;;  %v1377_v20 = vadd.s32 496, %v4628_v19 }
 0x285   : > { %v3059_v56 = vadd.f32 %v3058_v2, %v3057_v7  ;;  %v2909_v63 = vsel %vm5488_vm7, %v1563_v23, 0.0  ;;  %v2910_v34 = vsel %vm5503_vm9, %v1564_v53, 0.0  ;;  %vm5530_vm13 = vcmp.eq.s32.totalorder %v2016_v52, %v4650_v42 }
 0x286   : > { %v3060_v10 = vsel %vm2950_vm2, %v2909_v63, 0.0  ;;  %v3062_v9 = vsel %vm2950_vm2, %v2910_v34, 0.0  ;;  %v2030_v49 = vand.u32 3, %v1375_v43  ;;  %vm1471_vm14 = vcmp.lt.s32.totalorder %v1374_v8, %v4639_v54 }
 0x287   : > { %v3061_v59 = vadd.f32 %v3060_v10, %v3059_v56  ;;  %v1235_v24 = vpop.xlane.xlu1 %1234  ;;  %v1237_v38 = vpop.xlane.xlu0 %1236  ;;  %vm5536_vm15 = vcmp.eq.s32.totalorder %v2023_v61, %v4650_v42  ;;  %v2037_v33 = vand.u32 3, %v1376_v22  ;;  %vm1472_vm0 = vcmp.lt.s32.totalorder %v1375_v43, %v4639_v54 }
 0x288   : > { %v1565_v6 = vsel %vm1469_vm10, %v1235_v24, 0.0  ;;  %v1566_v41 = vsel %vm1470_vm12, %v1237_v38, 0.0  ;;  %v1378_v57 = vadd.s32 504, %v4628_v19  ;;  %v2044_v12 = vand.u32 3, %v1377_v20 }
 0x289   : > { %v3063_v58 = vadd.f32 %v3062_v9, %v3061_v59  ;;  %v2911_v11 = vsel %vm5517_vm11, %v1565_v6, 0.0  ;;  %v2912_v39 = vsel %vm5530_vm13, %v1566_v41, 0.0  ;;  %vm5553_vm1 = vcmp.eq.s32.totalorder %v2030_v49, %v4650_v42 }
 0x28a   : > { %v3064_v44 = vsel %vm2950_vm2, %v2911_v11, 0.0  ;;  %v3066_v55 = vsel %vm2950_vm2, %v2912_v39, 0.0  ;;  %v1379_v28 = vadd.s32 512, %v4628_v19  ;;  %vm1473_vm3 = vcmp.lt.s32.totalorder %v1376_v22, %v4639_v54 }
 0x28b   : > { %v3065_v25 = vadd.f32 %v3064_v44, %v3063_v58  ;;  %v1239_v35 = vpop.xlane.xlu1 %1238  ;;  %v1241_v21 = vpop.xlane.xlu0 %1240  ;;  %vm5560_vm4 = vcmp.eq.s32.totalorder %v2037_v33, %v4650_v42  ;;  %v1380_v32 = vadd.s32 520, %v4628_v19  ;;  %vm1474_vm5 = vcmp.lt.s32.totalorder %v1377_v20, %v4639_v54 }
 0x28c   : > { %v1567_v48 = vsel %vm1471_vm14, %v1239_v35, 0.0  ;;  %v1568_v30 = vsel %vm1472_vm0, %v1241_v21, 0.0  ;;  %v2051_v0 = vand.u32 3, %v1378_v57  ;;  %vm5575_vm6 = vcmp.eq.s32.totalorder %v2044_v12, %v4650_v42 }
 0x28d   : > { %v3067_v29 = vadd.f32 %v3066_v55, %v3065_v25  ;;  %v2913_v26 = vsel %vm5536_vm15, %v1567_v48, 0.0  ;;  %v2914_v27 = vsel %vm5553_vm1, %v1568_v30, 0.0  ;;  %v2058_v15 = vand.u32 3, %v1379_v28 }
 0x28e   : > { %v3068_v18 = vsel %vm2950_vm2, %v2913_v26, 0.0  ;;  %v3070_v36 = vsel %vm2950_vm2, %v2914_v27, 0.0  ;;  %v1381_v31 = vadd.s32 528, %v4628_v19  ;;  %vm1475_vm7 = vcmp.lt.s32.totalorder %v1378_v57, %v4639_v54 }
 0x28f   : > { %v3069_v50 = vadd.f32 %v3068_v18, %v3067_v29  ;;  %v1243_v8 = vpop.xlane.xlu1 %1242  ;;  %v1245_v37 = vpop.xlane.xlu0 %1244  ;;  %v2065_v40 = vand.u32 3, %v1380_v32  ;;  %v1382_v4 = vadd.s32 536, %v4628_v19  ;;  %vm5589_vm8 = vcmp.eq.s32.totalorder %v2051_v0, %v4650_v42 }
 0x290   : > { %v1569_v62 = vsel %vm1473_vm3, %v1243_v8, 0.0  ;;  %v1570_v51 = vsel %vm1474_vm5, %v1245_v37, 0.0  ;;  %v1383_v45 = vadd.s32 544, %v4628_v19  ;;  %vm1476_vm9 = vcmp.lt.s32.totalorder %v1379_v28, %v4639_v54 }
 0x291   : > { %v3071_v1 = vadd.f32 %v3070_v36, %v3069_v50  ;;  %v2915_v2 = vsel %vm5560_vm4, %v1569_v62, 0.0  ;;  %v2916_v52 = vsel %vm5575_vm6, %v1570_v51, 0.0  ;;  %vm5602_vm10 = vcmp.eq.s32.totalorder %v2058_v15, %v4650_v42 }
 0x292   : > { %v3072_v43 = vsel %vm2950_vm2, %v2915_v2, 0.0  ;;  %v3074_v7 = vsel %vm2950_vm2, %v2916_v52, 0.0  ;;  %v2072_v14 = vand.u32 3, %v1381_v31  ;;  %vm1477_vm11 = vcmp.lt.s32.totalorder %v1380_v32, %v4639_v54 }
 0x293   : > { %v3073_v61 = vadd.f32 %v3072_v43, %v3071_v1  ;;  %v1247_v22 = vpop.xlane.xlu1 %1246  ;;  %v1249_v23 = vpop.xlane.xlu0 %1248  ;;  %vm5608_vm12 = vcmp.eq.s32.totalorder %v2065_v40, %v4650_v42  ;;  %v2079_v13 = vand.u32 3, %v1382_v4  ;;  %vm1478_vm13 = vcmp.lt.s32.totalorder %v1381_v31, %v4639_v54 }
 0x294   : > { %v1571_v56 = vsel %vm1475_vm7, %v1247_v22, 0.0  ;;  %v1572_v63 = vsel %vm1476_vm9, %v1249_v23, 0.0  ;;  %v2086_v34 = vand.u32 3, %v1383_v45  ;;  %v1384_v60 = vadd.s32 552, %v4628_v19 }
 0x295   : > { %v3075_v20 = vadd.f32 %v3074_v7, %v3073_v61  ;;  %v2917_v10 = vsel %vm5589_vm8, %v1571_v56, 0.0  ;;  %v2918_v9 = vsel %vm5602_vm10, %v1572_v63, 0.0  ;;  %vm5623_vm14 = vcmp.eq.s32.totalorder %v2072_v14, %v4650_v42 }
 0x296   : > { %v3076_v49 = vsel %vm2950_vm2, %v2917_v10, 0.0  ;;  %v3078_v59 = vsel %vm2950_vm2, %v2918_v9, 0.0  ;;  %v1385_v38 = vadd.s32 560, %v4628_v19  ;;  %vm1479_vm15 = vcmp.lt.s32.totalorder %v1382_v4, %v4639_v54 }
 0x297   : > { %v3077_v46 = vadd.f32 %v3076_v49, %v3075_v20  ;;  %v1251_v33 = vpop.xlane.xlu1 %1250  ;;  %v1253_v6 = vpop.xlane.xlu0 %1252  ;;  %vm5630_vm0 = vcmp.eq.s32.totalorder %v2079_v13, %v4650_v42  ;;  %vm1480_vm1 = vcmp.lt.s32.totalorder %v1383_v45, %v4639_v54  ;;  %vm5640_vm3 = vcmp.eq.s32.totalorder %v2086_v34, %v4650_v42 }
 0x298   : > { %v1573_v57 = vsel %vm1477_vm11, %v1251_v33, 0.0  ;;  %v1574_v58 = vsel %vm1478_vm13, %v1253_v6, 0.0  ;;  %v1386_v39 = vadd.s32 568, %v4628_v19  ;;  %v2093_v16 = vand.u32 3, %v1384_v60 }
 0x299   : > { %v3079_v12 = vadd.f32 %v3078_v59, %v3077_v46  ;;  %v2919_v44 = vsel %vm5608_vm12, %v1573_v57, 0.0  ;;  %v2920_v55 = vsel %vm5623_vm14, %v1574_v58, 0.0  ;;  %v2100_v35 = vand.u32 3, %v1385_v38 }
 0x29a   : > { %v3080_v28 = vsel %vm2950_vm2, %v2919_v44, 0.0  ;;  %v3082_v25 = vsel %vm2950_vm2, %v2920_v55, 0.0  ;;  %v1387_v21 = vadd.s32 576, %v4628_v19  ;;  %vm1481_vm4 = vcmp.lt.s32.totalorder %v1384_v60, %v4639_v54 }
 0x29b   : > { %v3081_v47 = vadd.f32 %v3080_v28, %v3079_v12  ;;  %v1255_v32 = vpop.xlane.xlu1 %1254  ;;  %v1257_v48 = vpop.xlane.xlu0 %1256  ;;  %vm1482_vm5 = vcmp.lt.s32.totalorder %v1385_v38, %v4639_v54  ;;  %v1388_v30 = vadd.s32 584, %v4628_v19  ;;  %v2107_v26 = vand.u32 3, %v1386_v39 }
 0x29c   : > { %v1575_v0 = vsel %vm1479_vm15, %v1255_v32, 0.0  ;;  %v1576_v29 = vsel %vm1480_vm1, %v1257_v48, 0.0  ;;  %v1389_v27 = vadd.s32 592, %v4628_v19  ;;  %vm5665_vm6 = vcmp.eq.s32.totalorder %v2093_v16, %v4650_v42 }
 0x29d   : > { %v3083_v5 = vadd.f32 %v3082_v25, %v3081_v47  ;;  %v2921_v18 = vsel %vm5630_vm0, %v1575_v0, 0.0  ;;  %v2922_v36 = vsel %vm5640_vm3, %v1576_v29, 0.0  ;;  %vm5672_vm7 = vcmp.eq.s32.totalorder %v2100_v35, %v4650_v42 }
 0x29e   : > { %v3084_v31 = vsel %vm2950_vm2, %v2921_v18, 0.0  ;;  %v3086_v50 = vsel %vm2950_vm2, %v2922_v36, 0.0  ;;  %v2114_v37 = vand.u32 3, %v1387_v21  ;;  %vm1483_vm8 = vcmp.lt.s32.totalorder %v1386_v39, %v4639_v54 }
 0x29f   : > { %v3085_v40 = vadd.f32 %v3084_v31, %v3083_v5  ;;  %v1259_v4 = vpop.xlane.xlu1 %1258  ;;  %v1261_v62 = vpop.xlane.xlu0 %1260  ;;  %vm1484_vm9 = vcmp.lt.s32.totalorder %v1387_v21, %v4639_v54  ;;  %v2121_v51 = vand.u32 3, %v1388_v30  ;;  %vm5683_vm10 = vcmp.eq.s32.totalorder %v2107_v26, %v4650_v42 }
 0x2a0   : > { %v1577_v3 = vsel %vm1481_vm4, %v1259_v4, 0.0  ;;  %v1578_v45 = vsel %vm1482_vm5, %v1261_v62, 0.0  ;;  %v2128_v2 = vand.u32 3, %v1389_v27  ;;  %v1390_v17 = vadd.s32 600, %v4628_v19 }
 0x2a1   : > { %v3087_v52 = vadd.f32 %v3086_v50, %v3085_v40  ;;  %v2923_v43 = vsel %vm5665_vm6, %v1577_v3, 0.0  ;;  %v2924_v7 = vsel %vm5672_vm7, %v1578_v45, 0.0  ;;  %vm5695_vm11 = vcmp.eq.s32.totalorder %v2114_v37, %v4650_v42 }
 0x2a2   : > { %v3088_v14 = vsel %vm2950_vm2, %v2923_v43, 0.0  ;;  %v3090_v61 = vsel %vm2950_vm2, %v2924_v7, 0.0  ;;  %v1391_v23 = vadd.s32 608, %v4628_v19  ;;  %vm1485_vm12 = vcmp.lt.s32.totalorder %v1388_v30, %v4639_v54 }
 0x2a3   : > { %v3089_v53 = vadd.f32 %v3088_v14, %v3087_v52  ;;  %v1263_v13 = vpop.xlane.xlu1 %1262  ;;  %v1265_v56 = vpop.xlane.xlu0 %1264  ;;  %vm5702_vm13 = vcmp.eq.s32.totalorder %v2121_v51, %v4650_v42  ;;  %v1392_v34 = vadd.s32 616, %v4628_v19  ;;  %vm1486_vm14 = vcmp.lt.s32.totalorder %v1389_v27, %v4639_v54 }
 0x2a4   : > { %v1579_v20 = vsel %vm1483_vm8, %v1263_v13, 0.0  ;;  %v1580_v10 = vsel %vm1484_vm9, %v1265_v56, 0.0  ;;  %vm5713_vm15 = vcmp.eq.s32.totalorder %v2128_v2, %v4650_v42  ;;  %v2135_v24 = vand.u32 3, %v1390_v17 }
 0x2a5   : > { %v3091_v60 = vadd.f32 %v3090_v61, %v3089_v53  ;;  %v2925_v49 = vsel %vm5683_vm10, %v1579_v20, 0.0  ;;  %v2926_v59 = vsel %vm5695_vm11, %v1580_v10, 0.0  ;;  %v2142_v33 = vand.u32 3, %v1391_v23 }
 0x2a6   : > { %v3092_v38 = vsel %vm2950_vm2, %v2925_v49, 0.0  ;;  %v3094_v46 = vsel %vm2950_vm2, %v2926_v59, 0.0  ;;  %v1393_v6 = vadd.s32 624, %v4628_v19  ;;  %vm1487_vm0 = vcmp.lt.s32.totalorder %v1390_v17, %v4639_v54 }
 0x2a7   : > { %v3093_v41 = vadd.f32 %v3092_v38, %v3091_v60  ;;  %v1267_v57 = vpop.xlane.xlu1 %1266  ;;  %v1269_v58 = vpop.xlane.xlu0 %1268  ;;  %vm1488_vm1 = vcmp.lt.s32.totalorder %v1391_v23, %v4639_v54  ;;  %v2149_v11 = vand.u32 3, %v1392_v34  ;;  %v1394_v44 = vadd.s32 632, %v4628_v19 }
 0x2a8   : > { %v1581_v39 = vsel %vm1485_vm12, %v1267_v57, 0.0  ;;  %v1582_v12 = vsel %vm1486_vm14, %v1269_v58, 0.0  ;;  %v1395_v55 = vadd.s32 640, %v4628_v19  ;;  %vm5737_vm3 = vcmp.eq.s32.totalorder %v2135_v24, %v4650_v42 }
 0x2a9   : > { %v3095_v16 = vadd.f32 %v3094_v46, %v3093_v41  ;;  %v2927_v28 = vsel %vm5702_vm13, %v1581_v39, 0.0  ;;  %v2928_v25 = vsel %vm5713_vm15, %v1582_v12, 0.0  ;;  %vm5744_vm4 = vcmp.eq.s32.totalorder %v2142_v33, %v4650_v42 }
 0x2aa   : > { %v3096_v21 = vsel %vm2950_vm2, %v2927_v28, 0.0  ;;  %v3098_v47 = vsel %vm2950_vm2, %v2928_v25, 0.0  ;;  %v2156_v48 = vand.u32 3, %v1393_v6  ;;  %vm1489_vm5 = vcmp.lt.s32.totalorder %v1392_v34, %v4639_v54 }
 0x2ab   : > { %v3097_v30 = vadd.f32 %v3096_v21, %v3095_v16  ;;  %v1271_v0 = vpop.xlane.xlu1 %1270  ;;  %v1273_v29 = vpop.xlane.xlu0 %1272  ;;  %vm5750_vm6 = vcmp.eq.s32.totalorder %v2149_v11, %v4650_v42  ;;  %vm1490_vm7 = vcmp.lt.s32.totalorder %v1393_v6, %v4639_v54  ;;  %v2163_v18 = vand.u32 3, %v1394_v44 }
 0x2ac   : > { %v1583_v27 = vsel %vm1487_vm0, %v1271_v0, 0.0  ;;  %v1584_v5 = vsel %vm1488_vm1, %v1273_v29, 0.0  ;;  %v2170_v36 = vand.u32 3, %v1395_v55  ;;  %v1396_v8 = vadd.s32 648, %v4628_v19 }
 0x2ad   : > { %v3099_v15 = vadd.f32 %v3098_v47, %v3097_v30  ;;  %v2929_v31 = vsel %vm5737_vm3, %v1583_v27, 0.0  ;;  %v2930_v50 = vsel %vm5744_vm4, %v1584_v5, 0.0  ;;  %vm5767_vm8 = vcmp.eq.s32.totalorder %v2156_v48, %v4650_v42 }
 0x2ae   : > { %v3100_v37 = vsel %vm2950_vm2, %v2929_v31, 0.0  ;;  %v3102_v40 = vsel %vm2950_vm2, %v2930_v50, 0.0  ;;  %v1397_v62 = vadd.s32 656, %v4628_v19  ;;  %vm1491_vm9 = vcmp.lt.s32.totalorder %v1394_v44, %v4639_v54 }
 0x2af   : > { %v3101_v51 = vadd.f32 %v3100_v37, %v3099_v15  ;;  %v1275_v3 = vpop.xlane.xlu1 %1274  ;;  %v1277_v45 = vpop.xlane.xlu0 %1276  ;;  %vm1492_vm10 = vcmp.lt.s32.totalorder %v1395_v55, %v4639_v54  ;;  %v1398_v1 = vadd.s32 664, %v4628_v19  ;;  %vm5780_vm11 = vcmp.eq.s32.totalorder %v2163_v18, %v4650_v42 }
 0x2b0   : > { %v1585_v2 = vsel %vm1489_vm5, %v1275_v3, 0.0  ;;  %v1586_v52 = vsel %vm1490_vm7, %v1277_v45, 0.0  ;;  %vm5785_vm12 = vcmp.eq.s32.totalorder %v2170_v36, %v4650_v42  ;;  %v2177_v22 = vand.u32 3, %v1396_v8 }
 0x2b1   : > { %v3103_v17 = vadd.f32 %v3102_v40, %v3101_v51  ;;  %v2931_v14 = vsel %vm5750_vm6, %v1585_v2, 0.0  ;;  %v2932_v61 = vsel %vm5767_vm8, %v1586_v52, 0.0  ;;  %v2184_v13 = vand.u32 3, %v1397_v62 }
 0x2b2   : > { %v3104_v23 = vsel %vm2950_vm2, %v2931_v14, 0.0  ;;  %v3106_v53 = vsel %vm2950_vm2, %v2932_v61, 0.0  ;;  %v1399_v56 = vadd.s32 672, %v4628_v19  ;;  %vm1493_vm13 = vcmp.lt.s32.totalorder %v1396_v8, %v4639_v54 }
 0x2b3   : > { %v3105_v63 = vadd.f32 %v3104_v23, %v3103_v17  ;;  %v1279_v34 = vpop.xlane.xlu1 %1278  ;;  %v1281_v20 = vpop.xlane.xlu0 %1280  ;;  %vm1494_vm14 = vcmp.lt.s32.totalorder %v1397_v62, %v4639_v54  ;;  %v2191_v10 = vand.u32 3, %v1398_v1  ;;  %v1400_v49 = vadd.s32 680, %v4628_v19 }
 0x2b4   : > { %v1587_v9 = vsel %vm1491_vm9, %v1279_v34, 0.0  ;;  %v1588_v60 = vsel %vm1492_vm10, %v1281_v20, 0.0  ;;  %v1401_v59 = vadd.s32 688, %v4628_v19  ;;  %vm5809_vm15 = vcmp.eq.s32.totalorder %v2177_v22, %v4650_v42 }
 0x2b5   : > { %v3107_v24 = vadd.f32 %v3106_v53, %v3105_v63  ;;  %v2933_v38 = vsel %vm5780_vm11, %v1587_v9, 0.0  ;;  %v2934_v46 = vsel %vm5785_vm12, %v1588_v60, 0.0  ;;  %vm5816_vm0 = vcmp.eq.s32.totalorder %v2184_v13, %v4650_v42 }
 0x2b6   : > { %v3108_v6 = vsel %vm2950_vm2, %v2933_v38, 0.0  ;;  %v3110_v41 = vsel %vm2950_vm2, %v2934_v46, 0.0  ;;  %v2198_v58 = vand.u32 3, %v1399_v56  ;;  %vm1495_vm1 = vcmp.lt.s32.totalorder %v1398_v1, %v4639_v54 }
 0x2b7   : > { %v3109_v11 = vadd.f32 %v3108_v6, %v3107_v24  ;;  %v1283_v39 = vpop.xlane.xlu1 %1282  ;;  %v1285_v12 = vpop.xlane.xlu0 %1284  ;;  %vm5822_vm3 = vcmp.eq.s32.totalorder %v2191_v10, %v4650_v42  ;;  %vm1496_vm4 = vcmp.lt.s32.totalorder %v1399_v56, %v4639_v54  ;;  %v2205_v28 = vand.u32 3, %v1400_v49 }
 0x2b8   : > { %v1589_v55 = vsel %vm1493_vm13, %v1283_v39, 0.0  ;;  %v1590_v16 = vsel %vm1494_vm14, %v1285_v12, 0.0  ;;  %v2212_v25 = vand.u32 3, %v1401_v59  ;;  %v1402_v32 = vadd.s32 696, %v4628_v19 }
 0x2b9   : > { %v3111_v35 = vadd.f32 %v3110_v41, %v3109_v11  ;;  %v2935_v21 = vsel %vm5809_vm15, %v1589_v55, 0.0  ;;  %v2936_v47 = vsel %vm5816_vm0, %v1590_v16, 0.0  ;;  %vm5839_vm5 = vcmp.eq.s32.totalorder %v2198_v58, %v4650_v42 }
 0x2ba   : > { %v3112_v48 = vsel %vm2950_vm2, %v2935_v21, 0.0  ;;  %v3114_v30 = vsel %vm2950_vm2, %v2936_v47, 0.0  ;;  %v1403_v29 = vadd.s32 704, %v4628_v19  ;;  %vm1497_vm6 = vcmp.lt.s32.totalorder %v1400_v49, %v4639_v54 }
 0x2bb   : > { %v3113_v26 = vadd.f32 %v3112_v48, %v3111_v35  ;;  %v1287_v27 = vpop.xlane.xlu1 %1286  ;;  %v1289_v5 = vpop.xlane.xlu0 %1288  ;;  %vm1498_vm7 = vcmp.lt.s32.totalorder %v1401_v59, %v4639_v54  ;;  %v1404_v18 = vadd.s32 712, %v4628_v19  ;;  %vm5852_vm8 = vcmp.eq.s32.totalorder %v2205_v28, %v4650_v42 }
 0x2bc   : > { %v1591_v36 = vsel %vm1495_vm1, %v1287_v27, 0.0  ;;  %v1592_v15 = vsel %vm1496_vm4, %v1289_v5, 0.0  ;;  %vm5857_vm9 = vcmp.eq.s32.totalorder %v2212_v25, %v4650_v42  ;;  %v2219_v4 = vand.u32 3, %v1402_v32 }
 0x2bd   : > { %v3115_v8 = vadd.f32 %v3114_v30, %v3113_v26  ;;  %v2937_v37 = vsel %vm5822_vm3, %v1591_v36, 0.0  ;;  %v2938_v40 = vsel %vm5839_vm5, %v1592_v15, 0.0  ;;  %v2226_v3 = vand.u32 3, %v1403_v29 }
 0x2be   : > { %v3116_v62 = vsel %vm2950_vm2, %v2937_v37, 0.0  ;;  %v3118_v51 = vsel %vm2950_vm2, %v2938_v40, 0.0  ;;  %v1405_v45 = vadd.s32 720, %v4628_v19  ;;  %vm1499_vm10 = vcmp.lt.s32.totalorder %v1402_v32, %v4639_v54 }
 0x2bf   : > { %v3117_v1 = vadd.f32 %v3116_v62, %v3115_v8  ;;  %v1291_v2 = vpop.xlane.xlu1 %1290  ;;  %v1293_v52 = vpop.xlane.xlu0 %1292  ;;  %vm1500_vm11 = vcmp.lt.s32.totalorder %v1403_v29, %v4639_v54  ;;  %v2233_v43 = vand.u32 3, %v1404_v18  ;;  %v1406_v14 = vadd.s32 728, %v4628_v19 }
 0x2c0   : > { %v1593_v7 = vsel %vm1497_vm6, %v1291_v2, 0.0  ;;  %v1594_v17 = vsel %vm1498_vm7, %v1293_v52, 0.0  ;;  %v1407_v61 = vadd.s32 736, %v4628_v19  ;;  %vm5881_vm12 = vcmp.eq.s32.totalorder %v2219_v4, %v4650_v42 }
 0x2c1   : > { %v3119_v22 = vadd.f32 %v3118_v51, %v3117_v1  ;;  %v2939_v23 = vsel %vm5852_vm8, %v1593_v7, 0.0  ;;  %v2940_v53 = vsel %vm5857_vm9, %v1594_v17, 0.0  ;;  %vm5888_vm13 = vcmp.eq.s32.totalorder %v2226_v3, %v4650_v42 }
 0x2c2   : > { %v3120_v56 = vsel %vm2950_vm2, %v2939_v23, 0.0  ;;  %v3122_v63 = vsel %vm2950_vm2, %v2940_v53, 0.0  ;;  %v2240_v20 = vand.u32 3, %v1405_v45  ;;  %vm1501_vm14 = vcmp.lt.s32.totalorder %v1404_v18, %v4639_v54 }
 0x2c3   : > { %v3121_v10 = vadd.f32 %v3120_v56, %v3119_v22  ;;  %v1295_v9 = vpop.xlane.xlu1 %1294  ;;  %v1297_v60 = vpop.xlane.xlu0 %1296  ;;  %vm5894_vm15 = vcmp.eq.s32.totalorder %v2233_v43, %v4650_v42  ;;  %vm1502_vm0 = vcmp.lt.s32.totalorder %v1405_v45, %v4639_v54  ;;  %v2247_v38 = vand.u32 3, %v1406_v14 }
 0x2c4   : > { %v1595_v59 = vsel %vm1499_vm10, %v1295_v9, 0.0  ;;  %v1596_v24 = vsel %vm1500_vm11, %v1297_v60, 0.0  ;;  %v2254_v46 = vand.u32 3, %v1407_v61  ;;  %v1408_v57 = vadd.s32 744, %v4628_v19 }
 0x2c5   : > { %v3123_v33 = vadd.f32 %v3122_v63, %v3121_v10  ;;  %v2941_v6 = vsel %vm5881_vm12, %v1595_v59, 0.0  ;;  %v2942_v41 = vsel %vm5888_vm13, %v1596_v24, 0.0  ;;  %vm5911_vm1 = vcmp.eq.s32.totalorder %v2240_v20, %v4650_v42 }
 0x2c6   : > { %v3124_v58 = vsel %vm2950_vm2, %v2941_v6, 0.0  ;;  %v3126_v11 = vsel %vm2950_vm2, %v2942_v41, 0.0  ;;  %v1409_v12 = vadd.s32 752, %v4628_v19  ;;  %vm1503_vm3 = vcmp.lt.s32.totalorder %v1406_v14, %v4639_v54 }
 0x2c7   : > { %v3125_v44 = vadd.f32 %v3124_v58, %v3123_v33  ;;  %v1299_v55 = vpop.xlane.xlu1 %1298  ;;  %v1301_v16 = vpop.xlane.xlu0 %1300  ;;  %vm1504_vm4 = vcmp.lt.s32.totalorder %v1407_v61, %v4639_v54  ;;  %vm5923_vm5 = vcmp.eq.s32.totalorder %v2247_v38, %v4650_v42  ;;  %vm5928_vm6 = vcmp.eq.s32.totalorder %v2254_v46, %v4650_v42 }
 0x2c8   : > { %v1597_v28 = vsel %vm1501_vm14, %v1299_v55, 0.0  ;;  %v1598_v25 = vsel %vm1502_vm0, %v1301_v16, 0.0  ;;  %v2261_v30 = vand.u32 3, %v1408_v57  ;;  %v2268_v26 = vand.u32 3, %v1409_v12 }
 0x2c9   : > { %v3127_v47 = vadd.f32 %v3126_v11, %v3125_v44  ;;  %v2943_v32 = vsel %vm5894_vm15, %v1597_v28, 0.0  ;;  %v2944_v48 = vsel %vm5911_vm1, %v1598_v25, 0.0  ;;  %v1410_v27 = vadd.s32 760, %v4628_v19 }
 0x2ca   : > { %v3128_v0 = vsel %vm2950_vm2, %v2943_v32, 0.0  ;;  %v3130_v29 = vsel %vm2950_vm2, %v2944_v48, 0.0  ;;  %vm1505_vm7 = vcmp.lt.s32.totalorder %v1408_v57, %v4639_v54  ;;  %vm1506_vm8 = vcmp.lt.s32.totalorder %v1409_v12, %v4639_v54 }
 0x2cb   : > { %v3129_v5 = vadd.f32 %v3128_v0, %v3127_v47  ;;  %v1303_v18 = vpop.xlane.xlu1 %1302  ;;  %v1305_v36 = vpop.xlane.xlu0 %1304  ;;  %vm2851_vm9 = vcmp.eq.s32.totalorder %v2261_v30, %v4650_v42  ;;  %vm2852_vm10 = vcmp.eq.s32.totalorder %v2268_v26, %v4650_v42  ;;  %v2275_v4 = vand.u32 3, %v1410_v27 }
 0x2cc   : > { %v1599_v15 = vsel %vm1503_vm3, %v1303_v18, 0.0  ;;  %v1600_v31 = vsel %vm1504_vm4, %v1305_v36, 0.0  ;;  %vm1507_vm11 = vcmp.lt.s32.totalorder %v1410_v27, %v4639_v54 }
 0x2cd   : > { %v3131_v50 = vadd.f32 %v3130_v29, %v3129_v5  ;;  %v2945_v8 = vsel %vm5923_vm5, %v1599_v15, 0.0  ;;  %v2946_v19 = vsel %vm5928_vm6, %v1600_v31, 0.0  ;;  %vm2853_vm12 = vcmp.eq.s32.totalorder %v2275_v4, %v4650_v42 }
 0x2ce   : > { %v3132_v37 = vsel %vm2950_vm2, %v2945_v8, 0.0  ;;  %v3134_v40 = vsel %vm2950_vm2, %v2946_v19, 0.0 }
 0x2cf   : > { %v3133_v62 = vadd.f32 %v3132_v37, %v3131_v50  ;;  %v1307_v51 = vpop.xlane.xlu1 %1306  ;;  %v1309_v3 = vpop.xlane.xlu0 %1308 }
 0x2d0   : > { %v1601_v45 = vsel %vm1505_vm7, %v1307_v51, 0.0  ;;  %v1602_v1 = vsel %vm1506_vm8, %v1309_v3, 0.0 }
 0x2d1   : > { %v3135_v2 = vadd.f32 %v3134_v40, %v3133_v62  ;;  %v2947_v52 = vsel %vm2851_vm9, %v1601_v45, 0.0  ;;  %v2948_v43 = vsel %vm2852_vm10, %v1602_v1, 0.0 }
 0x2d2   : > { %v3136_v7 = vsel %vm2950_vm2, %v2947_v52, 0.0  ;;  %v3138_v17 = vsel %vm2950_vm2, %v2948_v43, 0.0 }
 0x2d3   : > { %v3137_v14 = vadd.f32 %v3136_v7, %v3135_v2  ;;  %v1311_v61 = vpop.xlane.xlu1 %1310 }
 0x2d4   : > { %v1603_v22 = vsel %vm1507_vm11, %v1311_v61, 0.0 }
 0x2d5   : > { %v3139_v23 = vadd.f32 %v3138_v17, %v3137_v14  ;;  %v2949_v53 = vsel %vm2853_vm12, %v1603_v22, 0.0 }
 0x2d6   : > { %v3140_v13 = vsel %vm2950_vm2, %v2949_v53, 0.0 }
 0x2d7   : > { %v3141_v56 = vadd.f32 %v3140_v13, %v3139_v23 }
 0x2d9   : > { %v3142_v63 = vrot.slane %v3141_v56, 4 }
 0x2db   : > { %v3143_v34 = vadd.f32 %v3142_v63, %v3141_v56 }
 0x2dd   : > { %v3144_v20 = vrot.slane %v3143_v34, 2 }
 0x2df   : > { %v3145_v54 = vadd.f32 %v3144_v20, %v3143_v34 }
 0x2e1   : > { %v3146_v10 = vrot.slane %v3145_v54, 1 }
 0x2e3   : > { %v3147_v42 = vadd.f32 %v3146_v10, %v3145_v54 }
 0x2e5   : > { %3148 = vst.msk [vmem:[%s256_s14] sm:$0xff] %vm2950_vm2, %v3147_v42 }
 0x2e6 PF: > { %p16_p12 = scmp.ge.s32.totalorder %s4178_s8, 5   ;;  %s6182_s15 = smov %s4012_s16 }
 0x2e7   : > { %s6183_s16 = smov %s4016_s17  ;;  %s6184_s17 = smov %s4188_s24 }
 0x2e8   : > { %s6185_s18 = smov %s4178_s8  ;;  %18 = sbr.rel (!%p16_p12) target bundleno = 5 (0x5), region = 88 }
 0x2ef   :  { %3168 = vsyncpa [#allocation3], 1 }
 0x2f0   :  { %3170 = vsyncpa [#allocation3 + $0x1], 1 }
 0x2f1   :  { %3171 = vsyncpa [#allocation5], 1 }
 0x2f2   :  { %3172 = vsyncpa [#allocation8], 1 }

</bundles_post_ra>
